<compile_context>
chip_gen: v7x
topology: tpu7x:2x2x1
jax: 0.10.0
libtpu: 0.0.40
codegen_flags: <defaults>
</compile_context>

<pallas_src>
import functools

import jax
import jax.numpy as jnp
from jax.experimental import pallas as pl
from jax.experimental.pallas import tpu as pltpu


def _round_up(x, m):
    return ((x + m - 1) // m) * m


def _pick_lane_tile(total, cap):
    """Largest power-of-two tile <= cap that divides `total` (total % 128 == 0)."""
    t = cap
    while total % t:
        t //= 2
    return t


# ---------------------------------------------------------------------------
# Tiled GEMM conv kernel: (M, Kdim) x (Kdim, Cout) with fused bias/LeakyReLU
# and (optionally) per-channel sum / sum-of-squares for BatchNorm.
# Grid = (Cout tiles, M tiles, Kdim reduction tiles); reduction innermost.
# ---------------------------------------------------------------------------
def _conv_gemm_kernel(*refs, nk, add_bias, fuse_lrelu, slope, with_stats):
    it = iter(refs)
    a_ref = next(it)                              # (tm, tk) bf16 patches tile
    w_ref = next(it)                              # (tk, tn) bf16 weight tile
    b_ref = next(it) if add_bias else None        # (1, tn)  f32 bias
    o_ref = next(it)                              # (tm, tn) f32 output
    sum_ref = next(it) if with_stats else None    # (1, tn)  f32 per-channel sum
    sq_ref = next(it) if with_stats else None     # (1, tn)  f32 per-channel sumsq
    acc_ref = next(it)                            # (tm, tn) f32 scratch accumulator

    i = pl.program_id(1)   # M-tile index
    k = pl.program_id(2)   # reduction-tile index

    @pl.when(k == 0)
    def _():
        acc_ref[...] = jnp.zeros_like(acc_ref)

    acc_ref[...] += jnp.dot(a_ref[...], w_ref[...],
                            preferred_element_type=jnp.float32)

    @pl.when(k == nk - 1)
    def _():
        y = acc_ref[...]
        if with_stats:
            # BN statistics of the (bias-free) conv output. The stats blocks'
            # index only depends on the outermost (Cout) grid axis, so they
            # stay VMEM-resident and accumulate across all M tiles.
            @pl.when(i == 0)
            def _():
                sum_ref[...] = jnp.zeros_like(sum_ref)
                sq_ref[...] = jnp.zeros_like(sq_ref)
            sum_ref[...] += jnp.sum(y, axis=0, keepdims=True)
            sq_ref[...] += jnp.sum(y * y, axis=0, keepdims=True)
        if add_bias:
            y = y + b_ref[...]
        if fuse_lrelu:
            y = jnp.where(y >= 0.0, y, slope * y)
        o_ref[...] = y.astype(o_ref.dtype)


def conv3d_gemm(x, w, b, *, stride, pad=1, fuse_lrelu=False, with_stats=False,
                slope=0.2):
    """Conv3d(k=4, stride, padding=1) as one tiled Pallas GEMM.

    x: (N, D, H, W, Cin) f32 channels-last;  w: (K, K, K, Cin, Cout);
    b: (Cout,) or None.  Returns (y2d, meta, stats):
      y2d  : (Mp, Cout_p) f32, rows = flattened (n, do, ho, wo), zero-padded
      stats: ((1, Cout_p) sum, (1, Cout_p) sumsq) or None
    """
    N, D, H, W, Cin = x.shape
    K = w.shape[0]
    Cout = w.shape[-1]
    s = stride
    Dout = (D + 2 * pad - K) // s + 1
    Hout = (H + 2 * pad - K) // s + 1
    Wout = (W + 2 * pad - K) // s + 1

    # Zero padding (left = pad, right = just enough for the last window).
    pd = max(0, s * (Dout - 1) + K - (D + pad))
    ph = max(0, s * (Hout - 1) + K - (H + pad))
    pw = max(0, s * (Wout - 1) + K - (W + pad))
    xpad = jnp.pad(x, ((0, 0), (pad, pd), (pad, ph), (pad, pw), (0, 0)))

    # im2col (pure layout glue in JAX): fold the K^3 taps into the contraction
    # so the MXU sees one dense matmul instead of 64 skinny Cin-deep matmuls.
    # TODO(synk): for production-size middle layers replace this host-side
    # materialization with in-kernel strided DMA of the activation windows.
    cols = []
    for kd in range(K):
        for kh in range(K):
            for kw in range(K):
                cols.append(xpad[:, kd:kd + s * Dout:s,
                                 kh:kh + s * Hout:s,
                                 kw:kw + s * Wout:s, :])
    M = N * Dout * Hout * Wout
    Kdim = K * K * K * Cin
    patches = jnp.stack(cols, axis=4).reshape(M, Kdim)

    # Tile sizes: lane dims padded to multiples of 128, sublane to 8.
    Cout_p = _round_up(Cout, 128)
    tn = _pick_lane_tile(Cout_p, 256)
    Kdim_p = _round_up(Kdim, 128)
    tk = _pick_lane_tile(Kdim_p, 512)
    Mp8 = _round_up(M, 8)
    tm = min(512, Mp8)
    Mp = _round_up(Mp8, tm)

    # bf16 operands for the MXU (accumulation stays f32 in the kernel).
    a = jnp.zeros((Mp, Kdim_p), jnp.bfloat16)
    a = a.at[:M, :Kdim].set(patches.astype(jnp.bfloat16))
    wp = jnp.zeros((Kdim_p, Cout_p), jnp.bfloat16)
    wp = wp.at[:Kdim, :Cout].set(w.reshape(Kdim, Cout).astype(jnp.bfloat16))

    nj, ni, nk = Cout_p // tn, Mp // tm, Kdim_p // tk
    add_bias = b is not None

    inputs = [a, wp]
    in_specs = [
        pl.BlockSpec((tm, tk), lambda j, i, k: (i, k)),
        pl.BlockSpec((tk, tn), lambda j, i, k: (k, j)),
    ]
    if add_bias:
        bp = jnp.zeros((1, Cout_p), jnp.float32).at[0, :Cout].set(
            b.astype(jnp.float32))
        inputs.append(bp)
        in_specs.append(pl.BlockSpec((1, tn), lambda j, i, k: (0, j)))

    out_shapes = [jax.ShapeDtypeStruct((Mp, Cout_p), jnp.float32)]
    out_specs = [pl.BlockSpec((tm, tn), lambda j, i, k: (i, j))]
    if with_stats:
        out_shapes += [jax.ShapeDtypeStruct((1, Cout_p), jnp.float32),
                       jax.ShapeDtypeStruct((1, Cout_p), jnp.float32)]
        out_specs += [pl.BlockSpec((1, tn), lambda j, i, k: (0, j)),
                      pl.BlockSpec((1, tn), lambda j, i, k: (0, j))]

    kernel = functools.partial(
        _conv_gemm_kernel, nk=nk, add_bias=add_bias,
        fuse_lrelu=fuse_lrelu, slope=slope, with_stats=with_stats)

    # VMEM budget: double-buffered in/out tiles + f32 accumulator, 2x headroom,
    # clamped to leave room on v7x (64 MiB physical VMEM).
    est = (2 * (tm * tk * 2 + tk * tn * 2 + (tn * 4 if add_bias else 0))
           + 2 * (tm * tn * 4 + (2 * tn * 4 if with_stats else 0))
           + tm * tn * 4)
    vmem_limit = int(min(max(2 * est, 16 * 2 ** 20), 48 * 2 ** 20))

    # Cout tiles always shard across cores; the M axis also accumulates the
    # per-channel stats when with_stats, so it must stay "arbitrary" then.
    dims = ("parallel",
            "arbitrary" if with_stats else "parallel",
            "arbitrary")

    outs = pl.pallas_call(
        kernel,
        out_shape=tuple(out_shapes),
        grid=(nj, ni, nk),
        in_specs=in_specs,
        out_specs=tuple(out_specs),
        scratch_shapes=[pltpu.VMEM((tm, tn), jnp.float32)],
        compiler_params=pltpu.CompilerParams(
            dimension_semantics=dims, vmem_limit_bytes=vmem_limit),
    )(*inputs)

    y2d = outs[0]
    stats = (outs[1], outs[2]) if with_stats else None
    meta = (N, Dout, Hout, Wout, Cout, M, Mp, Cout_p)
    return y2d, meta, stats


# ---------------------------------------------------------------------------
# BatchNorm3d (training-mode batch stats, from the conv-fused sums) + LeakyReLU
# tiled over the flattened spatial rows of the conv output.
# ---------------------------------------------------------------------------
def _bn_lrelu_kernel(x_ref, sum_ref, sq_ref, g_ref, b_ref, o_ref, *,
                     inv_count, eps, slope):
    mean = sum_ref[...] * inv_count
    var = sq_ref[...] * inv_count - mean * mean          # biased variance
    scale = g_ref[...] * jax.lax.rsqrt(var + eps)
    shift = b_ref[...] - mean * scale
    y = x_ref[...] * scale + shift
    o_ref[...] = jnp.where(y >= 0.0, y, slope * y)


def batchnorm_lrelu(y2d, stats, gamma, beta, count, *, eps=1e-5, slope=0.2):
    Mp, Cout_p = y2d.shape
    s_sum, s_sq = stats
    C = gamma.shape[0]
    g = jnp.ones((1, Cout_p), jnp.float32).at[0, :C].set(gamma.astype(jnp.float32))
    b = jnp.zeros((1, Cout_p), jnp.float32).at[0, :C].set(beta.astype(jnp.float32))

    tn = _pick_lane_tile(Cout_p, 256)
    tm = min(512, Mp)               # Mp is either < 512 or a multiple of 512
    ni, nj = Mp // tm, Cout_p // tn

    kernel = functools.partial(_bn_lrelu_kernel, inv_count=1.0 / float(count),
                               eps=eps, slope=slope)
    est = 2 * (tm * tn * 4 + 4 * tn * 4) + 2 * tm * tn * 4
    vmem_limit = int(min(max(2 * est, 16 * 2 ** 20), 48 * 2 ** 20))
    return pl.pallas_call(
        kernel,
        out_shape=jax.ShapeDtypeStruct((Mp, Cout_p), jnp.float32),
        grid=(ni, nj),
        in_specs=[
            pl.BlockSpec((tm, tn), lambda i, j: (i, j)),
            pl.BlockSpec((1, tn), lambda i, j: (0, j)),
            pl.BlockSpec((1, tn), lambda i, j: (0, j)),
            pl.BlockSpec((1, tn), lambda i, j: (0, j)),
            pl.BlockSpec((1, tn), lambda i, j: (0, j)),
        ],
        out_specs=pl.BlockSpec((tm, tn), lambda i, j: (i, j)),
        compiler_params=pltpu.CompilerParams(
            dimension_semantics=("parallel", "parallel"),
            vmem_limit_bytes=vmem_limit),
    )(y2d, s_sum, s_sq, g, b)
    # TODO(synk): BatchNorm running_mean/running_var buffer updates are a
    # training side effect that does not affect the forward output; not modeled.


# ---------------------------------------------------------------------------
# NLayerDiscriminator: parameter construction + forward
# ---------------------------------------------------------------------------
def make_discriminator_params(key, input_nc, ndf=64, n_layers=5):
    """Deterministic synthetic init mirroring the PyTorch __init__ structure."""
    kw = 4
    use_bias = False  # norm_layer == nn.BatchNorm3d
    cfgs = [dict(cin=input_nc, cout=ndf, stride=2, bias=True, bn=False, act=True)]
    nf_mult = 1
    for n in range(1, n_layers):
        nf_prev, nf_mult = nf_mult, min(2 ** n, 8)
        cfgs.append(dict(cin=ndf * nf_prev, cout=ndf * nf_mult, stride=2,
                         bias=use_bias, bn=True, act=True))
    nf_prev, nf_mult = nf_mult, min(2 ** n_layers, 8)
    cfgs.append(dict(cin=ndf * nf_prev, cout=ndf * nf_mult, stride=1,
                     bias=use_bias, bn=True, act=True))
    cfgs.append(dict(cin=ndf * nf_mult, cout=1, stride=1,
                     bias=True, bn=False, act=False))

    params = []
    for i, c in enumerate(cfgs):
        kw_key, kb_key = jax.random.split(jax.random.fold_in(key, i))
        w = 0.05 * jax.random.normal(kw_key, (kw, kw, kw, c["cin"], c["cout"]),
                                     jnp.float32)
        b_param = (0.05 * jax.random.normal(kb_key, (c["cout"],), jnp.float32)
                   if c["bias"] else None)      # zero bias is skipped entirely
        layer = dict(w=w, b=b_param, stride=c["stride"], bn=c["bn"], act=c["act"])
        if c["bn"]:
            layer["gamma"] = jnp.ones((c["cout"],), jnp.float32)
            layer["beta"] = jnp.zeros((c["cout"],), jnp.float32)
        params.append(layer)
    return params


def nlayer_discriminator_forward(params, x_ncdhw):
    # NCDHW -> NDHWC
    x = jnp.transpose(x_ncdhw, (0, 2, 3, 4, 1)).astype(jnp.float32)
    for layer in params:
        fuse = layer["act"] and not layer["bn"]   # first conv fuses LeakyReLU
        y2d, meta, stats = conv3d_gemm(
            x, layer["w"], layer["b"], stride=layer["stride"], pad=1,
            fuse_lrelu=fuse, with_stats=layer["bn"])
        N, Do, Ho, Wo, Cout, M, Mp, Cout_p = meta
        if layer["bn"]:
            y2d = batchnorm_lrelu(y2d, stats, layer["gamma"], layer["beta"], M)
        # Strip M / lane padding (incl. the 1->128 padded last conv) + reshape.
        x = y2d[:M, :Cout].reshape(N, Do, Ho, Wo, Cout)
    # NDHWC -> NCDHW
    return jnp.transpose(x, (0, 4, 1, 2, 3))


if __name__ == "__main__":
    key = jax.random.PRNGKey(0)
    k_x, k_p = jax.random.split(key)

    # Small config consistent with the module: input_nc=4, ndf=8, n_layers=2.
    N, C, D, H, W = 2, 4, 16, 16, 16
    x = jax.random.normal(k_x, (N, C, D, H, W), jnp.float32)

    params = make_discriminator_params(k_p, input_nc=C, ndf=8, n_layers=2)
    out = nlayer_discriminator_forward(params, x)
    out = jax.block_until_ready(out)

    # Expected PatchGAN output: 16 -> 8 -> 4 -> 3 -> 2 spatially, 1 channel.
    assert out.shape == (2, 1, 2, 2, 2), out.shape
    assert out.dtype == jnp.float32
    assert bool(jnp.all(jnp.isfinite(out)))
    print("KERNEL_OK")
</pallas_src>

<mosaic_0001>
module attributes {stable_mosaic.version = 11 : i64} {
  func.func @_conv_gemm_kernel(%arg0: i32, %arg1: i32, %arg2: i32, %arg3: memref<512x256xbf16, #tpu.memory_space<vmem>>, %arg4: memref<256x128xbf16, #tpu.memory_space<vmem>>, %arg5: memref<1x128xf32, #tpu.memory_space<vmem>>, %arg6: memref<512x128xf32, #tpu.memory_space<vmem>>, %arg7: memref<512x128xf32, #tpu.memory_space<vmem>>) attributes {dimension_semantics = [#tpu.dimension_semantics<parallel>, #tpu.dimension_semantics<parallel>, #tpu.dimension_semantics<arbitrary>], iteration_bounds = array<i64: 1, 2, 1>, scalar_prefetch = 0 : i64, scratch_operands = 1 : i64, tpu.core_type = #tpu.core_type<tc>, window_params = [{transform_indices = @transform_0, window_bounds = array<i64: 512, 256>}, {transform_indices = @transform_1, window_bounds = array<i64: 256, 128>}, {transform_indices = @transform_2, window_bounds = array<i64: 1, 128>}, {transform_indices = @transform_3, window_bounds = array<i64: 512, 128>}]} {
    %c0_i32 = arith.constant 0 : i32
    %0 = arith.cmpi eq, %arg2, %c0_i32 : i32
    %1 = arith.extui %0 : i1 to i32
    %c0_i32_0 = arith.constant 0 : i32
    %2 = arith.cmpi ne, %1, %c0_i32_0 : i32
    scf.if %2 {
      %cst_10 = arith.constant 0.000000e+00 : f32
      %12 = vector.broadcast %cst_10 : f32 to vector<512x128xf32>
      %c0_11 = arith.constant 0 : index
      %c0_12 = arith.constant 0 : index
      %13 = vector.load %arg7[%c0_11, %c0_12] : memref<512x128xf32, #tpu.memory_space<vmem>>, vector<512x128xf32>
      tpu.vector_store %arg7[%c0_11, %c0_12], %12 {strides = array<i32>} : memref<512x128xf32, #tpu.memory_space<vmem>>, vector<512x128xf32>,
    } else {
    }
    %c0 = arith.constant 0 : index
    %c0_1 = arith.constant 0 : index
    %3 = vector.load %arg7[%c0, %c0_1] : memref<512x128xf32, #tpu.memory_space<vmem>>, vector<512x128xf32>
    %c0_2 = arith.constant 0 : index
    %c0_3 = arith.constant 0 : index
    %4 = vector.load %arg3[%c0_2, %c0_3] : memref<512x256xbf16, #tpu.memory_space<vmem>>, vector<512x256xbf16>
    %c0_4 = arith.constant 0 : index
    %c0_5 = arith.constant 0 : index
    %5 = vector.load %arg4[%c0_4, %c0_5] : memref<256x128xbf16, #tpu.memory_space<vmem>>, vector<256x128xbf16>
    %cst = arith.constant dense<0.000000e+00> : vector<512x128xf32>
    %6 = tpu.matmul %4, %5, %cst {dimension_numbers = #tpu.dot_dimension_numbers<[1], [0], [0], [1], [0, 0, 1, 1], [], []>} : vector<512x256xbf16>, vector<256x128xbf16>, vector<512x128xf32> -> vector<512x128xf32>
    %7 = arith.addf %3, %6 : vector<512x128xf32>
    %c0_6 = arith.constant 0 : index
    %c0_7 = arith.constant 0 : index
    %8 = vector.load %arg7[%c0_6, %c0_7] : memref<512x128xf32, #tpu.memory_space<vmem>>, vector<512x128xf32>
    tpu.vector_store %arg7[%c0_6, %c0_7], %7 {strides = array<i32>} : memref<512x128xf32, #tpu.memory_space<vmem>>, vector<512x128xf32>,
    %c0_i32_8 = arith.constant 0 : i32
    %9 = arith.cmpi eq, %arg2, %c0_i32_8 : i32
    %10 = arith.extui %9 : i1 to i32
    %c0_i32_9 = arith.constant 0 : i32
    %11 = arith.cmpi ne, %10, %c0_i32_9 : i32
    scf.if %11 {
      %c0_10 = arith.constant 0 : index
      %c0_11 = arith.constant 0 : index
      %12 = vector.load %arg7[%c0_10, %c0_11] : memref<512x128xf32, #tpu.memory_space<vmem>>, vector<512x128xf32>
      %c0_12 = arith.constant 0 : index
      %c0_13 = arith.constant 0 : index
      %13 = vector.load %arg5[%c0_12, %c0_13] : memref<1x128xf32, #tpu.memory_space<vmem>>, vector<1x128xf32>
      %14 = vector.broadcast %13 : vector<1x128xf32> to vector<512x128xf32>
      %15 = arith.addf %12, %14 : vector<512x128xf32>
      %cst_14 = arith.constant 0.000000e+00 : f32
      %16 = vector.broadcast %cst_14 : f32 to vector<512x128xf32>
      %17 = arith.cmpf oge, %15, %16 : vector<512x128xf32>
      %cst_15 = arith.constant 2.000000e-01 : f32
      %18 = vector.broadcast %cst_15 : f32 to vector<512x128xf32>
      %19 = arith.mulf %18, %15 : vector<512x128xf32>
      %20 = arith.select %17, %15, %19 : vector<512x128xi1>, vector<512x128xf32>
      %c0_16 = arith.constant 0 : index
      %c0_17 = arith.constant 0 : index
      %21 = vector.load %arg6[%c0_16, %c0_17] : memref<512x128xf32, #tpu.memory_space<vmem>>, vector<512x128xf32>
      tpu.vector_store %arg6[%c0_16, %c0_17], %20 {strides = array<i32>} : memref<512x128xf32, #tpu.memory_space<vmem>>, vector<512x128xf32>,
    } else {
    }
    return
  }
  func.func @transform_0(%arg0: i32, %arg1: i32, %arg2: i32) -> (i32, i32) {
    %c0_i32 = arith.constant 0 : i32
    return %arg1, %arg2 : i32, i32
  }
  func.func @transform_1(%arg0: i32, %arg1: i32, %arg2: i32) -> (i32, i32) {
    %c0_i32 = arith.constant 0 : i32
    return %arg2, %arg0 : i32, i32
  }
  func.func @transform_2(%arg0: i32, %arg1: i32, %arg2: i32) -> (i32, i32) {
    %c0_i32 = arith.constant 0 : i32
    %c0_i32_0 = arith.constant 0 : i32
    return %c0_i32, %arg0 : i32, i32
  }
  func.func @transform_3(%arg0: i32, %arg1: i32, %arg2: i32) -> (i32, i32) {
    %c0_i32 = arith.constant 0 : i32
    return %arg1, %arg0 : i32, i32
  }
}

</mosaic_0001>

<bundles_post_ra>
// kernel: tpu_custom_call.1
= control target key start
LH: loop header
LB: loop body
LE: loop exit
PB: predicated region body
PF: predicated region fallthrough
CT: control target
= control target key end

     0   :  { %8 = vsyncpa [#allocation4], 0  ;;  %s2805_s0 = inlined_call_operand.hbm [shape: bf16[1024,256], index: 0, kind: input, shape index: {}]   ;;  %s2806_s1 = inlined_call_operand.hbm [shape: bf16[256,128], index: 1, kind: input, shape index: {}]   ;;  %s2807_s2 = inlined_call_operand.vmem [shape: f32[1,128], index: 2, kind: input, shape index: {}]   ;;  %s2808_s3 = inlined_call_operand.hbm [shape: f32[1024,128], index: 3, kind: output, shape index: {}]  }
   0x1   :  { %10 = vsyncpa [#allocation4 + $0x1], 0 }
   0x2   :  { %11 = vsyncpa [#allocation7], 0 }
   0x3   :  { %12 = vsyncpa [#allocation5], 0 }
   0x4   :  { %14 = vsyncpa [#allocation5 + $0x1], 0  ;;  %s2348_s12 = smov 0   ;;  %s2350_s13 = smov 0  }
   0x5   :  { %s2352_s14 = smov 0   ;;  %s2354_s15 = smov 0  }
   0x6   :  { %s2356_s16 = smov 0   ;;  %s2358_s17 = smov 0  }
   0x7 LB: > { %s1845_s18 = sadd.s32 4294967295, %s2316_s17   ;;  %s1846_s19 = sadd.s32 4294967294, %s2316_s17   ;;  %s2316_s17 = sphi %s2358_s17, %s20_s17   ;;  %s2312_s16 = sphi %s2356_s16, %s2832_s16   ;;  %s2308_s15 = sphi %s2354_s15, %s2831_s15   ;;  %s2304_s14 = sphi %s2352_s14, %s2830_s14   ;;  %s2300_s13 = sphi %s2350_s13, %s2829_s13   ;;  %s2296_s12 = sphi %s2348_s12, %s2828_s12  }
   0x8   : > { %p61_p0 = scmp.ne.s32.totalorder %s2300_s13, %s2296_s12  ;;  %p2382_p1 = scmp.eq.s32.totalorder %s1845_s18, 0 }
   0x9   : > { %p2386_p2 = scmp.eq.s32.totalorder %s1845_s18, 1  ;;  %p147_p3 = scmp.eq.s32.totalorder %s1846_s19, 1 }
   0xa   : > { %s2813_s20 = scalar_select %p2382_p1, 1, 0 }
   0xb   : > { %s2814_s21 = scalar_select %p2386_p2, 1, 0 }
   0xc   : > { %p2392_p4 = por %p2382_p1, %p61_p0  ;;  %p1847_p5 = scmp.ge.s32.totalorder %s2316_s17, 1 }
   0xd   : > { %p2397_p6 = por %p147_p3, %p61_p0  ;;  %p154_p7 = scmp.lt.s32.totalorder %s2316_s17, 3 }
   0xe   : > { %s2815_s22 = scalar_select %p2392_p4, 1, 0 }
   0xf   : > { %s2816_s23 = scalar_select %p2397_p6, 1, 0 }
  0x10   : > { %p2402_p8 = pnand %p1847_p5, %p154_p7  ;;  %s2318_s25 = smov [#allocation6]  }
  0x11   : > { %s170_s26 = sshll.u32 %s2318_s25, 4  ;;  %s35_s28 = sadd.s32 1, %s2312_s16  ;;  %s171_s26 = int_to_ptr.vmem [resolvable:$true] %s170_s26 }
  0x12   : > { %s2817_s24 = scalar_select %p2402_p8, 1, 0 }
  0x13   : > { %p1988_p9 = pneg %p2402_p8  ;;  %s2172_s4 = scalar_lea.hbm %s2806_s1, 2048 }
  0x14   : > { %p2173_p12 = scmp.ne.s32.totalorder %s2806_s1, %s2172_s4  ;;  %p2179_p5 = scmp.lt.u32.totalorder %s2172_s4, %s2806_s1 }
  0x15   : > { %p2411_p11 = pnand %p1988_p9, %p2382_p1 }
  0x17   : > { %p2174_p13 = pneg %p2411_p11 }
  0x19   : > { %p2175_p0 = pnand %p2174_p13, %p2173_p12 }
  0x1b   : > { %p2176_p3 = pneg %p2175_p0 }
  0x1d   : > { %p2181_p7 = pnand %p2179_p5, %p2176_p3 }
  0x1f   : > { %2184 = shalt.err (!%p2181_p7)
}
  0x20   : > { %s2185_s9 = scalar_lea.vmem %s171_s26, 2048  ;;  %p2193_p1 = scmp.lt.s32.totalorder %s171_s26, %s171_s26 }
  0x21   : > { %p2186_p9 = scmp.ne.s32.totalorder %s171_s26, %s2185_s9  ;;  %p2194_p4 = scmp.lt.s32.totalorder %s2185_s9, %s2185_s9 }
  0x23   : > { %p2188_p10 = pnand %p2186_p9, %p2174_p13  ;;  %p2195_p8 = por %p2194_p4, %p2193_p1 }
  0x25   : > { %p2189_p6 = pneg %p2188_p10 }
  0x27   : > { %p2196_p2 = pnand %p2195_p8, %p2189_p6 }
  0x29   : > { %2199 = shalt.err (!%p2196_p2)
}
  0x2a   : > { %s2319_s10 = smov 64   ;;  %s2320_s11 = smov 4  }
  0x2b   : > { %1991 = dma.hbm_to_vmem [thread:$0]  (!%p2411_p11), %s2806_s1, 2048, %s171_s26, [#allocation7], %s2319_s10, %s2319_s10, %s2320_s11  }
  0x2c   : > { %p37_p1 = scmp.ge.s32.totalorder %s35_s28, 2  ;;  %s48_s25 = sadd.s32 1, %s2304_s14 }
  0x2d   : > { %p55_p2 = scmp.ne.s32.totalorder %s2304_s14, %s2300_s13  ;;  %p56_p4 = scmp.eq.s32.totalorder %s2316_s17, 0 }
  0x2e   : > { %s2834_s28 = smov (%p37_p1, %s35_s28), 0  ;;  %p2820_p8 = scmp.ne.s32.totalorder %s2814_s21, 0 }
  0x2f   : > { %p2438_p6 = por %p56_p4, %p55_p2  ;;  %s43_s27 = ssub.s32 %s2312_s16, %s2834_s28 }
  0x30   : > { %p2444_p10 = por %p2820_p8, %p55_p2  ;;  %p2001_p12 = scmp.lt.s32.totalorder %s2316_s17, 2 }
  0x31   : > { %p46_p11 = scmp.eq.s32.totalorder %s43_s27, 0  ;;  %s190_s26 = sand.u32 1, %s2304_s14  }
  0x32   : > { %s1851_s4 = sshll.u32 %s190_s26, 9  ;;  %s1946_s6 = sshll.u32 %s2312_s16, 13 }
  0x33   : > { %s2453_s5 = scalar_select %p46_p11, %s2304_s14, %s48_s25  }
  0x34   : > { %s2459_s9 = scalar_lea.hbm %s2805_s0, %s1946_s6  ;;  %s194_s21 = scalar_lea.vmem [#allocation3], %s1851_s4 }
  0x35   : > { %s204_s10 = sshll.u32 %s194_s21, 4  ;;  %p2465_p13 = pnand %p2001_p12, %p2438_p6  ;;  %s2461_s10 = int_to_ptr.vmem [resolvable:$true] %s204_s10 }
  0x36   : > { %s2469_s18 = scalar_lea.sflag [#allocation4], %s190_s26  ;;  %s2200_s19 = scalar_lea.hbm %s2459_s9, 8192 }
  0x37   : > { %p2201_p0 = scmp.ne.s32.totalorder %s2459_s9, %s2200_s19  ;;  %p2202_p3 = pneg %p2465_p13 }
  0x38   : > { %s2205_s29 = scalar_lea.hbm %s2805_s0, 16384  ;;  %p2206_p9 = scmp.lt.u32.totalorder %s2459_s9, %s2805_s0 }
  0x39   : > { %p2203_p5 = pnand %p2202_p3, %p2201_p0  ;;  %p2207_p1 = scmp.lt.u32.totalorder %s2205_s29, %s2200_s19 }
  0x3a   : > { %p2209_p4 = scmp.lt.u32.totalorder %s2200_s19, %s2459_s9 }
  0x3b   : > { %p2204_p7 = pneg %p2203_p5  ;;  %p2208_p2 = por %p2207_p1, %p2206_p9 }
  0x3d   : > { %p2210_p6 = por %p2209_p4, %p2208_p2 }
  0x3f   : > { %p2211_p8 = pnand %p2210_p6, %p2204_p7 }
  0x41   : > { %2214 = shalt.err (!%p2211_p8)
}
  0x42   : > { %s2215_s26 = scalar_lea.vmem %s2461_s10, 8192  ;;  %s2321_s7 = smov [#allocation3]  }
  0x43   : > { %p2216_p12 = scmp.ne.s32.totalorder %s2461_s10, %s2215_s26  ;;  %s2220_s8 = sshll.u32 %s2321_s7, 4  ;;  %s2221_s8 = int_to_ptr.vmem [resolvable:$false] %s2220_s8 }
  0x44   : > { %s2222_s21 = scalar_lea.vmem %s2221_s8, 16384  ;;  %p2223_p5 = scmp.lt.s32.totalorder %s2461_s10, %s2221_s8 }
  0x45   : > { %p2218_p11 = pnand %p2216_p12, %p2202_p3  ;;  %p2224_p9 = scmp.lt.s32.totalorder %s2222_s21, %s2215_s26 }
  0x47   : > { %p2219_p0 = pneg %p2218_p11  ;;  %p2225_p1 = por %p2224_p9, %p2223_p5 }
  0x49   : > { %p2226_p2 = pnand %p2225_p1, %p2219_p0 }
  0x4b   : > { %2229 = shalt.err (!%p2226_p2)
}
  0x4c   : > { %s2322_s19 = smov 128   ;;  %s2323_s25 = smov 8  }
  0x4d   : > { %1995 = dma.hbm_to_vmem [thread:$0]  (!%p2465_p13), %s2459_s9, 8192, %s2461_s10, %s2469_s18, %s2322_s19, %s2322_s19, %s2323_s25  }
  0x4e   : > { %p2823_p3 = scmp.ne.s32.totalorder %s2817_s24, 0 }
  0x4f   : > { %s2500_s27 = sand.u32 (!%p2823_p3), 1, %s2300_s13   ;;  %p2824_p7 = scmp.ne.s32.totalorder (!%p2823_p3), %s2815_s22, 0 }
  0x50   : > { %216 = sbr.rel (%p2823_p3) target bundleno = 512 (0x200), region = 32  ;;  %s1856_s29 = sshll.u32 (!%p2823_p3), %s2500_s27, 9 }
  0x51   : > { %s219_s4 = scalar_lea.sflag (!%p2823_p3), [#allocation4], %s2500_s27  ;;  %s2506_s6 = scalar_lea.vmem (!%p2823_p3), [#allocation3], %s1856_s29 }
  0x57   : > { %2283 = dma.done.wait (%p2824_p7), %s219_s4, 8192  }
  0x58   : > { %2285 = vsyncadd (%p2824_p7), %s219_s4, 4294959104  ;;  %p2825_p13 = scmp.ne.s32.totalorder %s2813_s20, 0 }
  0x5a   : > { %2287 = dma.done.wait (%p2825_p13), [#allocation7], 2048  }
  0x5b   : > { %2289 = vsyncadd (%p2825_p13), [#allocation7], 4294965248  ;;  %v2324_v0 = vmov 0   ;;  %v2060_v1 = vld [vmem:[#allocation6] sm:$0xff]   ;;  %v2061_v2 = vld [vmem:[#allocation6 + $0x8] sm:$0xff]   ;;  %s2623_s24 = scalar_lea.vmem [#allocation8], %s1856_s29 }
  0x5c   : > { %904 = vmatprep.subr.bf16.mxu0 %v2324_v0  ;;  %1948 = vmatprep.subr.bf16.mxu1 %v2324_v0  ;;  %v2062_v3 = vld [vmem:[#allocation6 + $0x10] sm:$0xff]   ;;  %v2063_v4 = vld [vmem:[#allocation6 + $0x18] sm:$0xff]   ;;  %v2064_v5 = vld [vmem:[#allocation6 + $0x20] sm:$0xff]   ;;  %s1947_s9 = sshll.u32 %s2308_s15, 13  ;;  %s1730_s10 = sshll.u32 %s2623_s24, 4  ;;  %s2754_s10 = int_to_ptr.vmem [resolvable:$true] %s1730_s10 }
  0x5d   : > { %905 = vmatpush1.bf16.msra.mxu0 %v2060_v1  ;;  %1964 = vmatpush1.bf16.msra.mxu1 %v2060_v1  ;;  %v2078_v6 = vld [vmem:[%s2506_s6 + $0x4] ss:$8 sps:$4 sm:$0xff]   ;;  %v2066_v9 = vld [vmem:[#allocation6 + $0x30] sm:$0xff]   ;;  %v2067_v10 = vld [vmem:[#allocation6 + $0x38] sm:$0xff]   ;;  %s2752_s18 = scalar_lea.hbm %s2808_s3, %s1947_s9  ;;  %s1716_s26 = scalar_lea.sflag [#allocation5], %s2500_s27 }
  0x5e   : > { %906 = vmatprep.subr.bf16.mxu0 %v2324_v0  ;;  %1949 = vmatprep.subr.bf16.mxu1 %v2324_v0  ;;  %v2065_v7 = vld [vmem:[#allocation6 + $0x28] sm:$0xff]   ;;  %v2068_v11 = vld [vmem:[#allocation6 + $0x40] sm:$0xff]   ;;  %v2070_v13 = vld [vmem:[#allocation6 + $0x50] sm:$0xff]   ;;  %s2230_s7 = scalar_lea.vmem %s2754_s10, 8192  ;;  %s2325_s8 = smov [#allocation8]  }
  0x5f   : > { %v2081_v8 = vld [vmem:[%s2506_s6 + $0x104] ss:$8 sps:$4 sm:$0xff]   ;;  %936 = vmatprep.mubr.bf16.mxu0 %v2078_v6  ;;  %v2071_v14 = vld [vmem:[#allocation6 + $0x58] sm:$0xff]   ;;  %v2074_v17 = vld [vmem:[#allocation6 + $0x70] sm:$0xff]   ;;  %p2231_p4 = scmp.ne.s32.totalorder %s2754_s10, %s2230_s7  ;;  %s2234_s21 = sshll.u32 %s2325_s8, 4  ;;  %s2235_s21 = int_to_ptr.vmem [resolvable:$false] %s2234_s21 }
  0x60   : > { %1064 = vmatprep.mubr.bf16.mxu1 %v2081_v8  ;;  %v2069_v12 = vld [vmem:[#allocation6 + $0x48] sm:$0xff]   ;;  %v2072_v15 = vld [vmem:[#allocation6 + $0x60] sm:$0xff]   ;;  %v2075_v18 = vld [vmem:[#allocation6 + $0x78] sm:$0xff]   ;;  %s2236_s19 = scalar_lea.vmem %s2235_s21, 16384  ;;  %p2237_p12 = scmp.lt.s32.totalorder %s2754_s10, %s2235_s21 }
  0x61   : > { %907 = vmatpush1.bf16.msra.mxu0 %v2061_v2  ;;  %1965 = vmatpush1.bf16.msra.mxu1 %v2061_v2  ;;  %v2073_v16 = vld [vmem:[#allocation6 + $0x68] sm:$0xff]   ;;  %v2082_v21 = vld [vmem:[%s2506_s6 + $0x14] ss:$8 sps:$4 sm:$0xff]   ;;  %v2086_v23 = vld [vmem:[%s2506_s6 + $0x10] ss:$8 sps:$4 sm:$0xff]   ;;  %p2232_p6 = pnand %p2231_p4, %p2444_p10  ;;  %p2238_p11 = scmp.lt.s32.totalorder %s2236_s19, %s2230_s7 }
  0x62   : > { %908 = vmatprep.subr.bf16.mxu0 %v2324_v0  ;;  %1950 = vmatprep.subr.bf16.mxu1 %v2324_v0  ;;  %v2076_v19 = vld [vmem:[%s2506_s6] ss:$8 sps:$4 sm:$0xff]   ;;  %v2084_v22 = vld [vmem:[%s2506_s6 + $0x114] ss:$8 sps:$4 sm:$0xff]   ;;  %v2087_v24 = vld [vmem:[%s2506_s6 + $0x110] ss:$8 sps:$4 sm:$0xff]  }
  0x63   : > { %v2079_v20 = vld [vmem:[%s2506_s6 + $0x100] ss:$8 sps:$4 sm:$0xff]   ;;  %v2088_v25 = vld [vmem:[%s2506_s6 + $0x24] ss:$8 sps:$4 sm:$0xff]   ;;  %v2094_v29 = vld [vmem:[%s2506_s6 + $0x34] ss:$8 sps:$4 sm:$0xff]   ;;  %p2233_p8 = pneg %p2232_p6  ;;  %p2239_p0 = por %p2238_p11, %p2237_p12 }
  0x64   : > { %v2090_v26 = vld [vmem:[%s2506_s6 + $0x124] ss:$8 sps:$4 sm:$0xff]   ;;  %v2092_v27 = vld [vmem:[%s2506_s6 + $0x20] ss:$8 sps:$4 sm:$0xff]   ;;  %v2096_v30 = vld [vmem:[%s2506_s6 + $0x134] ss:$8 sps:$4 sm:$0xff]  }
  0x65   : > { %909 = vmatpush1.bf16.msra.mxu0 %v2062_v3  ;;  %1966 = vmatpush1.bf16.msra.mxu1 %v2062_v3  ;;  %v2093_v28 = vld [vmem:[%s2506_s6 + $0x120] ss:$8 sps:$4 sm:$0xff]   ;;  %v2098_v31 = vld [vmem:[%s2506_s6 + $0x30] ss:$8 sps:$4 sm:$0xff]   ;;  %v2100_v33 = vld [vmem:[%s2506_s6 + $0x44] ss:$8 sps:$4 sm:$0xff]   ;;  %p2240_p5 = pnand %p2239_p0, %p2233_p8 }
  0x66   : > { %910 = vmatprep.subr.bf16.mxu0 %v2324_v0  ;;  %1951 = vmatprep.subr.bf16.mxu1 %v2324_v0  ;;  %v2099_v32 = vld [vmem:[%s2506_s6 + $0x130] ss:$8 sps:$4 sm:$0xff]   ;;  %v2102_v34 = vld [vmem:[%s2506_s6 + $0x144] ss:$8 sps:$4 sm:$0xff]   ;;  %v2104_v35 = vld [vmem:[%s2506_s6 + $0x40] ss:$8 sps:$4 sm:$0xff]  }
  0x67   : > { %v2105_v36 = vld [vmem:[%s2506_s6 + $0x140] ss:$8 sps:$4 sm:$0xff]   ;;  %v2106_v37 = vld [vmem:[%s2506_s6 + $0x54] ss:$8 sps:$4 sm:$0xff]   ;;  %v2110_v39 = vld [vmem:[%s2506_s6 + $0x50] ss:$8 sps:$4 sm:$0xff]  }
  0x68   : > { %v2108_v38 = vld [vmem:[%s2506_s6 + $0x154] ss:$8 sps:$4 sm:$0xff]   ;;  %v2111_v40 = vld [vmem:[%s2506_s6 + $0x150] ss:$8 sps:$4 sm:$0xff]   ;;  %v2112_v41 = vld [vmem:[%s2506_s6 + $0x64] ss:$8 sps:$4 sm:$0xff]  }
  0x69   : > { %911 = vmatpush1.bf16.msra.mxu0 %v2063_v4  ;;  %1967 = vmatpush1.bf16.msra.mxu1 %v2063_v4  ;;  %v2114_v42 = vld [vmem:[%s2506_s6 + $0x164] ss:$8 sps:$4 sm:$0xff]   ;;  %v2116_v43 = vld [vmem:[%s2506_s6 + $0x60] ss:$8 sps:$4 sm:$0xff]   ;;  %v2118_v45 = vld [vmem:[%s2506_s6 + $0x74] ss:$8 sps:$4 sm:$0xff]  }
  0x6a   : > { %912 = vmatprep.subr.bf16.mxu0 %v2324_v0  ;;  %1952 = vmatprep.subr.bf16.mxu1 %v2324_v0  ;;  %v2117_v44 = vld [vmem:[%s2506_s6 + $0x160] ss:$8 sps:$4 sm:$0xff]   ;;  %v2120_v46 = vld [vmem:[%s2506_s6 + $0x174] ss:$8 sps:$4 sm:$0xff]   ;;  %v2122_v47 = vld [vmem:[%s2506_s6 + $0x70] ss:$8 sps:$4 sm:$0xff]  }
  0x6b   : > { %v2123_v48 = vld [vmem:[%s2506_s6 + $0x170] ss:$8 sps:$4 sm:$0xff]   ;;  %v2124_v49 = vld [vmem:[%s2506_s6 + $0x84] ss:$8 sps:$4 sm:$0xff]   ;;  %v2128_v51 = vld [vmem:[%s2506_s6 + $0x80] ss:$8 sps:$4 sm:$0xff]  }
  0x6c   : > { %v2126_v50 = vld [vmem:[%s2506_s6 + $0x184] ss:$8 sps:$4 sm:$0xff]   ;;  %v2129_v52 = vld [vmem:[%s2506_s6 + $0x180] ss:$8 sps:$4 sm:$0xff]   ;;  %v2130_v53 = vld [vmem:[%s2506_s6 + $0x94] ss:$8 sps:$4 sm:$0xff]  }
  0x6d   : > { %913 = vmatpush1.bf16.msra.mxu0 %v2064_v5  ;;  %1968 = vmatpush1.bf16.msra.mxu1 %v2064_v5  ;;  %v2132_v54 = vld [vmem:[%s2506_s6 + $0x194] ss:$8 sps:$4 sm:$0xff]   ;;  %v2134_v55 = vld [vmem:[%s2506_s6 + $0x90] ss:$8 sps:$4 sm:$0xff]   ;;  %v2136_v57 = vld [vmem:[%s2506_s6 + $0xa4] ss:$8 sps:$4 sm:$0xff]  }
  0x6e   : > { %914 = vmatprep.subr.bf16.mxu0 %v2324_v0  ;;  %1953 = vmatprep.subr.bf16.mxu1 %v2324_v0  ;;  %v2135_v56 = vld [vmem:[%s2506_s6 + $0x190] ss:$8 sps:$4 sm:$0xff]   ;;  %v2138_v58 = vld [vmem:[%s2506_s6 + $0x1a4] ss:$8 sps:$4 sm:$0xff]   ;;  %v2140_v59 = vld [vmem:[%s2506_s6 + $0xa0] ss:$8 sps:$4 sm:$0xff]  }
  0x6f   : > { %v2141_v60 = vld [vmem:[%s2506_s6 + $0x1a0] ss:$8 sps:$4 sm:$0xff]   ;;  %v2142_v61 = vld [vmem:[%s2506_s6 + $0xb4] ss:$8 sps:$4 sm:$0xff]   ;;  %v2146_v63 = vld [vmem:[%s2506_s6 + $0xb0] ss:$8 sps:$4 sm:$0xff]  }
  0x70   : > { %v2144_v62 = vld [vmem:[%s2506_s6 + $0x1b4] ss:$8 sps:$4 sm:$0xff]   ;;  %v2148_v1 = vld [vmem:[%s2506_s6 + $0xc4] ss:$8 sps:$4 sm:$0xff]   ;;  %v2152_v3 = vld [vmem:[%s2506_s6 + $0xc0] ss:$8 sps:$4 sm:$0xff]  }
  0x71   : > { %915 = vmatpush1.bf16.msra.mxu0 %v2065_v7  ;;  %1969 = vmatpush1.bf16.msra.mxu1 %v2065_v7  ;;  %v2150_v2 = vld [vmem:[%s2506_s6 + $0x1c4] ss:$8 sps:$4 sm:$0xff]   ;;  %v2153_v4 = vld [vmem:[%s2506_s6 + $0x1c0] ss:$8 sps:$4 sm:$0xff]   ;;  %v2154_v5 = vld [vmem:[%s2506_s6 + $0xd4] ss:$8 sps:$4 sm:$0xff]  }
  0x72   : > { %916 = vmatprep.subr.bf16.mxu0 %v2324_v0  ;;  %1954 = vmatprep.subr.bf16.mxu1 %v2324_v0  ;;  %v2156_v6 = vld [vmem:[%s2506_s6 + $0x1d4] ss:$8 sps:$4 sm:$0xff]   ;;  %v2158_v7 = vld [vmem:[%s2506_s6 + $0xd0] ss:$8 sps:$4 sm:$0xff]  }
  0x73   : > { %v2159_v8 = vld [vmem:[%s2506_s6 + $0x1d0] ss:$8 sps:$4 sm:$0xff]  }
  0x75   : > { %917 = vmatpush1.bf16.msra.mxu0 %v2066_v9  ;;  %1970 = vmatpush1.bf16.msra.mxu1 %v2066_v9  ;;  %v2160_v9 = vld [vmem:[%s2506_s6 + $0xe4] ss:$8 sps:$4 sm:$0xff]  }
  0x76   : > { %918 = vmatprep.subr.bf16.mxu0 %v2324_v0  ;;  %1955 = vmatprep.subr.bf16.mxu1 %v2324_v0 }
  0x79   : > { %919 = vmatpush1.bf16.msra.mxu0 %v2067_v10  ;;  %1971 = vmatpush1.bf16.msra.mxu1 %v2067_v10  ;;  %v2162_v10 = vld [vmem:[%s2506_s6 + $0x1e4] ss:$8 sps:$4 sm:$0xff]  }
  0x7a   : > { %920 = vmatprep.subr.bf16.mxu0 %v2324_v0  ;;  %1956 = vmatprep.subr.bf16.mxu1 %v2324_v0 }
  0x7d   : > { %921 = vmatpush1.bf16.msra.mxu0 %v2068_v11  ;;  %1972 = vmatpush1.bf16.msra.mxu1 %v2068_v11  ;;  %v2164_v11 = vld [vmem:[%s2506_s6 + $0xe0] ss:$8 sps:$4 sm:$0xff]  }
  0x7e   : > { %922 = vmatprep.subr.bf16.mxu0 %v2324_v0  ;;  %1957 = vmatprep.subr.bf16.mxu1 %v2324_v0 }
  0x81   : > { %923 = vmatpush1.bf16.msra.mxu0 %v2069_v12  ;;  %1973 = vmatpush1.bf16.msra.mxu1 %v2069_v12  ;;  %v2165_v12 = vld [vmem:[%s2506_s6 + $0x1e0] ss:$8 sps:$4 sm:$0xff]  }
  0x82   : > { %924 = vmatprep.subr.bf16.mxu0 %v2324_v0  ;;  %1958 = vmatprep.subr.bf16.mxu1 %v2324_v0 }
  0x85   : > { %925 = vmatpush1.bf16.msra.mxu0 %v2070_v13  ;;  %1974 = vmatpush1.bf16.msra.mxu1 %v2070_v13  ;;  %v2166_v13 = vld [vmem:[%s2506_s6 + $0xf4] ss:$8 sps:$4 sm:$0xff]  }
  0x86   : > { %926 = vmatprep.subr.bf16.mxu0 %v2324_v0  ;;  %1959 = vmatprep.subr.bf16.mxu1 %v2324_v0 }
  0x89   : > { %927 = vmatpush1.bf16.msra.mxu0 %v2071_v14  ;;  %1975 = vmatpush1.bf16.msra.mxu1 %v2071_v14  ;;  %v2168_v14 = vld [vmem:[%s2506_s6 + $0x1f4] ss:$8 sps:$4 sm:$0xff]  }
  0x8a   : > { %928 = vmatprep.subr.bf16.mxu0 %v2324_v0  ;;  %1960 = vmatprep.subr.bf16.mxu1 %v2324_v0 }
  0x8d   : > { %929 = vmatpush1.bf16.msra.mxu0 %v2072_v15  ;;  %1976 = vmatpush1.bf16.msra.mxu1 %v2072_v15  ;;  %v2170_v15 = vld [vmem:[%s2506_s6 + $0xf0] ss:$8 sps:$4 sm:$0xff]  }
  0x8e   : > { %930 = vmatprep.subr.bf16.mxu0 %v2324_v0  ;;  %1961 = vmatprep.subr.bf16.mxu1 %v2324_v0 }
  0x91   : > { %931 = vmatpush1.bf16.msra.mxu0 %v2073_v16  ;;  %1977 = vmatpush1.bf16.msra.mxu1 %v2073_v16  ;;  %v2171_v16 = vld [vmem:[%s2506_s6 + $0x1f0] ss:$8 sps:$4 sm:$0xff]  }
  0x92   : > { %932 = vmatprep.subr.bf16.mxu0 %v2324_v0  ;;  %1962 = vmatprep.subr.bf16.mxu1 %v2324_v0 }
  0x95   : > { %933 = vmatpush1.bf16.msra.mxu0 %v2074_v17  ;;  %1978 = vmatpush1.bf16.msra.mxu1 %v2074_v17  ;;  %v2615_v17 = vld [vmem:[%s2807_s2] ss:$0 sm:$0xff] }
  0x96   : > { %934 = vmatprep.subr.bf16.mxu0 %v2324_v0  ;;  %1963 = vmatprep.subr.bf16.mxu1 %v2324_v0  ;;  %v2147_v0 = vld [vmem:[%s2506_s6 + $0x1b0] ss:$8 sps:$4 sm:$0xff]  }
  0x99   : > { %935 = vmatpush1.bf16.msra.mxu0 %v2075_v18  ;;  %1979 = vmatpush1.bf16.msra.mxu1 %v2075_v18 }
  0x9c   : > { %937 = vmatmul.mubr.bf16.vlgmr.msra.gmra.mrb[0].mxu0 %v2076_v19  ;;  %1065 = vmatmul.mubr.bf16.vlgmr.msra.gmra.mrb[0].mxu1 %v2079_v20 }
  0x9d   : > { %944 = vmatprep.mubr.bf16.mxu0 %v2082_v21  ;;  %1072 = vmatprep.mubr.bf16.mxu1 %v2084_v22 }
  0xa4   : > { %945 = vmatmul.mubr.bf16.gmra.mrb[4].mxu0 %v2086_v23  ;;  %1073 = vmatmul.mubr.bf16.gmra.mrb[4].mxu1 %v2087_v24 }
  0xa5   : > { %952 = vmatprep.mubr.bf16.mxu0 %v2088_v25  ;;  %1080 = vmatprep.mubr.bf16.mxu1 %v2090_v26 }
  0xac   : > { %953 = vmatmul.mubr.bf16.gmra.mrb[8].mxu0 %v2092_v27  ;;  %1081 = vmatmul.mubr.bf16.gmra.mrb[8].mxu1 %v2093_v28 }
  0xad   : > { %960 = vmatprep.mubr.bf16.mxu0 %v2094_v29  ;;  %1088 = vmatprep.mubr.bf16.mxu1 %v2096_v30 }
  0xb4   : > { %961 = vmatmul.mubr.bf16.gmra.mrb[12].mxu0 %v2098_v31  ;;  %1089 = vmatmul.mubr.bf16.gmra.mrb[12].mxu1 %v2099_v32 }
  0xb5   : > { %968 = vmatprep.mubr.bf16.mxu0 %v2100_v33  ;;  %1096 = vmatprep.mubr.bf16.mxu1 %v2102_v34 }
  0xbc   : > { %969 = vmatmul.mubr.bf16.gmra.mrb[16].mxu0 %v2104_v35  ;;  %1097 = vmatmul.mubr.bf16.gmra.mrb[16].mxu1 %v2105_v36 }
  0xbd   : > { %976 = vmatprep.mubr.bf16.mxu0 %v2106_v37  ;;  %1104 = vmatprep.mubr.bf16.mxu1 %v2108_v38 }
  0xc4   : > { %977 = vmatmul.mubr.bf16.gmra.mrb[20].mxu0 %v2110_v39  ;;  %1105 = vmatmul.mubr.bf16.gmra.mrb[20].mxu1 %v2111_v40 }
  0xc5   : > { %984 = vmatprep.mubr.bf16.mxu0 %v2112_v41  ;;  %1112 = vmatprep.mubr.bf16.mxu1 %v2114_v42 }
  0xcc   : > { %985 = vmatmul.mubr.bf16.gmra.mrb[24].mxu0 %v2116_v43  ;;  %1113 = vmatmul.mubr.bf16.gmra.mrb[24].mxu1 %v2117_v44 }
  0xcd   : > { %992 = vmatprep.mubr.bf16.mxu0 %v2118_v45  ;;  %1120 = vmatprep.mubr.bf16.mxu1 %v2120_v46 }
  0xd4   : > { %993 = vmatmul.mubr.bf16.gmra.mrb[28].mxu0 %v2122_v47  ;;  %1121 = vmatmul.mubr.bf16.gmra.mrb[28].mxu1 %v2123_v48 }
  0xd5   : > { %1000 = vmatprep.mubr.bf16.mxu0 %v2124_v49  ;;  %1128 = vmatprep.mubr.bf16.mxu1 %v2126_v50 }
  0xdc   : > { %1001 = vmatmul.mubr.bf16.gmra.mrb[32].mxu0 %v2128_v51  ;;  %1129 = vmatmul.mubr.bf16.gmra.mrb[32].mxu1 %v2129_v52 }
  0xdd   : > { %1008 = vmatprep.mubr.bf16.mxu0 %v2130_v53  ;;  %1136 = vmatprep.mubr.bf16.mxu1 %v2132_v54 }
  0xe4   : > { %1009 = vmatmul.mubr.bf16.gmra.mrb[36].mxu0 %v2134_v55  ;;  %1137 = vmatmul.mubr.bf16.gmra.mrb[36].mxu1 %v2135_v56 }
  0xe5   : > { %1016 = vmatprep.mubr.bf16.mxu0 %v2136_v57  ;;  %1144 = vmatprep.mubr.bf16.mxu1 %v2138_v58 }
  0xec   : > { %1017 = vmatmul.mubr.bf16.gmra.mrb[40].mxu0 %v2140_v59  ;;  %1145 = vmatmul.mubr.bf16.gmra.mrb[40].mxu1 %v2141_v60 }
  0xed   : > { %1024 = vmatprep.mubr.bf16.mxu0 %v2142_v61  ;;  %1152 = vmatprep.mubr.bf16.mxu1 %v2144_v62 }
  0xf4   : > { %1025 = vmatmul.mubr.bf16.gmra.mrb[44].mxu0 %v2146_v63  ;;  %1153 = vmatmul.mubr.bf16.gmra.mrb[44].mxu1 %v2147_v0 }
  0xf5   : > { %1032 = vmatprep.mubr.bf16.mxu0 %v2148_v1  ;;  %1160 = vmatprep.mubr.bf16.mxu1 %v2150_v2 }
  0xfc   : > { %1033 = vmatmul.mubr.bf16.gmra.mrb[48].mxu0 %v2152_v3  ;;  %1161 = vmatmul.mubr.bf16.gmra.mrb[48].mxu1 %v2153_v4 }
  0xfd   : > { %1040 = vmatprep.mubr.bf16.mxu0 %v2154_v5  ;;  %1168 = vmatprep.mubr.bf16.mxu1 %v2156_v6 }
 0x104   : > { %1041 = vmatmul.mubr.bf16.gmra.mrb[52].mxu0 %v2158_v7  ;;  %1169 = vmatmul.mubr.bf16.gmra.mrb[52].mxu1 %v2159_v8 }
 0x105   : > { %1048 = vmatprep.mubr.bf16.mxu0 %v2160_v9  ;;  %1176 = vmatprep.mubr.bf16.mxu1 %v2162_v10 }
 0x10c   : > { %1049 = vmatmul.mubr.bf16.gmra.mrb[56].mxu0 %v2164_v11  ;;  %1177 = vmatmul.mubr.bf16.gmra.mrb[56].mxu1 %v2165_v12 }
 0x10d   : > { %1056 = vmatprep.mubr.bf16.mxu0 %v2166_v13  ;;  %1184 = vmatprep.mubr.bf16.mxu1 %v2168_v14 }
 0x114   : > { %1057 = vmatmul.mubr.bf16.gmra.mrb[60].mxu0 %v2170_v15  ;;  %1185 = vmatmul.mubr.bf16.gmra.mrb[60].mxu1 %v2171_v16 }
 0x16f   : > { %v938_v18 = vpop.f32.mrb[0].mxu0  ;;  %v1066_v19 = vpop.f32.mrb[0].mxu1 }
 0x170   : > { %v1395_v20 = vadd.f32 %v2615_v17, %v938_v18  ;;  %v1427_v21 = vadd.f32 %v2615_v17, %v1066_v19  ;;  %v940_v22 = vpop.f32.mrb[1].mxu0  ;;  %v1068_v23 = vpop.f32.mrb[1].mxu1 }
 0x171   : > { %v941_v24 = vpop.f32.mrb[2].mxu0  ;;  %v1069_v25 = vpop.f32.mrb[2].mxu1 }
 0x172   : > { %vm1459_vm0 = vcmp.ge.f32.partialorder %v1395_v20, 0.0  ;;  %v1523_v26 = vmul.f32 0.2, %v1395_v20  ;;  %vm1491_vm1 = vcmp.ge.f32.partialorder %v1427_v21, 0.0  ;;  %v1555_v27 = vmul.f32 0.2, %v1427_v21 }
 0x173   : > { %v1396_v28 = vadd.f32 %v2615_v17, %v941_v24  ;;  %v1428_v29 = vadd.f32 %v2615_v17, %v1069_v25  ;;  %v943_v30 = vpop.f32.mrb[3].mxu0  ;;  %v1071_v31 = vpop.f32.mrb[3].mxu1 }
 0x174   : > { %v1587_v32 = vsel %vm1459_vm0, %v1395_v20, %v1523_v26  ;;  %v1619_v33 = vsel %vm1491_vm1, %v1427_v21, %v1555_v27 }
 0x175   : > { %1651 = vst [vmem:[%s2623_s24] sm:$0xff] %v1587_v32  ;;  %1683 = vst [vmem:[%s2623_s24 + $0x100] sm:$0xff] %v1619_v33  ;;  %vm1460_vm2 = vcmp.ge.f32.partialorder %v1396_v28, 0.0  ;;  %v1524_v34 = vmul.f32 0.2, %v1396_v28  ;;  %vm1492_vm3 = vcmp.ge.f32.partialorder %v1428_v29, 0.0 }
 0x176   : > { %v1556_v35 = vmul.f32 0.2, %v1428_v29 }
 0x177   : > { %v1588_v36 = vsel %vm1460_vm2, %v1396_v28, %v1524_v34  ;;  %v946_v38 = vpop.f32.mrb[4].mxu0  ;;  %v1074_v39 = vpop.f32.mrb[4].mxu1 }
 0x178   : > { %v1620_v37 = vsel %vm1492_vm3, %v1428_v29, %v1556_v35  ;;  %1652 = vst [vmem:[%s2623_s24 + $0x8] sm:$0xff] %v1588_v36  ;;  %v1397_v40 = vadd.f32 %v2615_v17, %v946_v38  ;;  %v1429_v41 = vadd.f32 %v2615_v17, %v1074_v39  ;;  %v948_v42 = vpop.f32.mrb[5].mxu0  ;;  %v1076_v43 = vpop.f32.mrb[5].mxu1 }
 0x179   : > { %1684 = vst [vmem:[%s2623_s24 + $0x108] sm:$0xff] %v1620_v37  ;;  %v949_v44 = vpop.f32.mrb[6].mxu0  ;;  %v1077_v45 = vpop.f32.mrb[6].mxu1 }
 0x17a   : > { %vm1461_vm4 = vcmp.ge.f32.partialorder %v1397_v40, 0.0  ;;  %v1525_v46 = vmul.f32 0.2, %v1397_v40  ;;  %vm1493_vm5 = vcmp.ge.f32.partialorder %v1429_v41, 0.0  ;;  %v1557_v47 = vmul.f32 0.2, %v1429_v41 }
 0x17b   : > { %v1398_v48 = vadd.f32 %v2615_v17, %v949_v44  ;;  %v1430_v49 = vadd.f32 %v2615_v17, %v1077_v45  ;;  %v951_v50 = vpop.f32.mrb[7].mxu0  ;;  %v1079_v51 = vpop.f32.mrb[7].mxu1 }
 0x17c   : > { %v1589_v52 = vsel %vm1461_vm4, %v1397_v40, %v1525_v46  ;;  %v1621_v53 = vsel %vm1493_vm5, %v1429_v41, %v1557_v47 }
 0x17d   : > { %1653 = vst [vmem:[%s2623_s24 + $0x10] sm:$0xff] %v1589_v52  ;;  %1685 = vst [vmem:[%s2623_s24 + $0x110] sm:$0xff] %v1621_v53  ;;  %vm1462_vm6 = vcmp.ge.f32.partialorder %v1398_v48, 0.0  ;;  %v1526_v54 = vmul.f32 0.2, %v1398_v48  ;;  %vm1494_vm7 = vcmp.ge.f32.partialorder %v1430_v49, 0.0 }
 0x17e   : > { %v1558_v55 = vmul.f32 0.2, %v1430_v49 }
 0x17f   : > { %v1590_v56 = vsel %vm1462_vm6, %v1398_v48, %v1526_v54  ;;  %v954_v58 = vpop.f32.mrb[8].mxu0  ;;  %v1082_v59 = vpop.f32.mrb[8].mxu1 }
 0x180   : > { %v1622_v57 = vsel %vm1494_vm7, %v1430_v49, %v1558_v55  ;;  %1654 = vst [vmem:[%s2623_s24 + $0x18] sm:$0xff] %v1590_v56  ;;  %v1399_v60 = vadd.f32 %v2615_v17, %v954_v58  ;;  %v1431_v61 = vadd.f32 %v2615_v17, %v1082_v59  ;;  %v956_v62 = vpop.f32.mrb[9].mxu0  ;;  %v1084_v63 = vpop.f32.mrb[9].mxu1 }
 0x181   : > { %1686 = vst [vmem:[%s2623_s24 + $0x118] sm:$0xff] %v1622_v57  ;;  %v957_v0 = vpop.f32.mrb[10].mxu0  ;;  %v1085_v1 = vpop.f32.mrb[10].mxu1 }
 0x182   : > { %vm1463_vm8 = vcmp.ge.f32.partialorder %v1399_v60, 0.0  ;;  %v1527_v2 = vmul.f32 0.2, %v1399_v60  ;;  %vm1495_vm9 = vcmp.ge.f32.partialorder %v1431_v61, 0.0  ;;  %v1559_v3 = vmul.f32 0.2, %v1431_v61 }
 0x183   : > { %v1400_v4 = vadd.f32 %v2615_v17, %v957_v0  ;;  %v1432_v5 = vadd.f32 %v2615_v17, %v1085_v1  ;;  %v959_v6 = vpop.f32.mrb[11].mxu0  ;;  %v1087_v7 = vpop.f32.mrb[11].mxu1 }
 0x184   : > { %v1591_v8 = vsel %vm1463_vm8, %v1399_v60, %v1527_v2  ;;  %v1623_v9 = vsel %vm1495_vm9, %v1431_v61, %v1559_v3 }
 0x185   : > { %1655 = vst [vmem:[%s2623_s24 + $0x20] sm:$0xff] %v1591_v8  ;;  %1687 = vst [vmem:[%s2623_s24 + $0x120] sm:$0xff] %v1623_v9  ;;  %vm1464_vm10 = vcmp.ge.f32.partialorder %v1400_v4, 0.0  ;;  %v1528_v10 = vmul.f32 0.2, %v1400_v4  ;;  %vm1496_vm11 = vcmp.ge.f32.partialorder %v1432_v5, 0.0 }
 0x186   : > { %v1560_v11 = vmul.f32 0.2, %v1432_v5 }
 0x187   : > { %v1592_v12 = vsel %vm1464_vm10, %v1400_v4, %v1528_v10  ;;  %v962_v14 = vpop.f32.mrb[12].mxu0  ;;  %v1090_v15 = vpop.f32.mrb[12].mxu1 }
 0x188   : > { %v1624_v13 = vsel %vm1496_vm11, %v1432_v5, %v1560_v11  ;;  %1656 = vst [vmem:[%s2623_s24 + $0x28] sm:$0xff] %v1592_v12  ;;  %v1401_v16 = vadd.f32 %v2615_v17, %v962_v14  ;;  %v1433_v18 = vadd.f32 %v2615_v17, %v1090_v15  ;;  %v964_v19 = vpop.f32.mrb[13].mxu0  ;;  %v1092_v20 = vpop.f32.mrb[13].mxu1 }
 0x189   : > { %1688 = vst [vmem:[%s2623_s24 + $0x128] sm:$0xff] %v1624_v13  ;;  %v965_v21 = vpop.f32.mrb[14].mxu0  ;;  %v1093_v22 = vpop.f32.mrb[14].mxu1 }
 0x18a   : > { %vm1465_vm12 = vcmp.ge.f32.partialorder %v1401_v16, 0.0  ;;  %v1529_v23 = vmul.f32 0.2, %v1401_v16  ;;  %vm1497_vm13 = vcmp.ge.f32.partialorder %v1433_v18, 0.0  ;;  %v1561_v24 = vmul.f32 0.2, %v1433_v18 }
 0x18b   : > { %v1402_v25 = vadd.f32 %v2615_v17, %v965_v21  ;;  %v1434_v26 = vadd.f32 %v2615_v17, %v1093_v22  ;;  %v967_v27 = vpop.f32.mrb[15].mxu0  ;;  %v1095_v28 = vpop.f32.mrb[15].mxu1 }
 0x18c   : > { %v1593_v29 = vsel %vm1465_vm12, %v1401_v16, %v1529_v23  ;;  %v1625_v30 = vsel %vm1497_vm13, %v1433_v18, %v1561_v24 }
 0x18d   : > { %1657 = vst [vmem:[%s2623_s24 + $0x30] sm:$0xff] %v1593_v29  ;;  %1689 = vst [vmem:[%s2623_s24 + $0x130] sm:$0xff] %v1625_v30  ;;  %vm1466_vm14 = vcmp.ge.f32.partialorder %v1402_v25, 0.0  ;;  %v1530_v31 = vmul.f32 0.2, %v1402_v25  ;;  %vm1498_vm15 = vcmp.ge.f32.partialorder %v1434_v26, 0.0 }
 0x18e   : > { %v1562_v32 = vmul.f32 0.2, %v1434_v26 }
 0x18f   : > { %v1594_v33 = vsel %vm1466_vm14, %v1402_v25, %v1530_v31  ;;  %v970_v35 = vpop.f32.mrb[16].mxu0  ;;  %v1098_v36 = vpop.f32.mrb[16].mxu1 }
 0x190   : > { %v1626_v34 = vsel %vm1498_vm15, %v1434_v26, %v1562_v32  ;;  %1658 = vst [vmem:[%s2623_s24 + $0x38] sm:$0xff] %v1594_v33  ;;  %v1403_v37 = vadd.f32 %v2615_v17, %v970_v35  ;;  %v1435_v38 = vadd.f32 %v2615_v17, %v1098_v36  ;;  %v972_v39 = vpop.f32.mrb[17].mxu0  ;;  %v1100_v40 = vpop.f32.mrb[17].mxu1 }
 0x191   : > { %1690 = vst [vmem:[%s2623_s24 + $0x138] sm:$0xff] %v1626_v34  ;;  %v973_v41 = vpop.f32.mrb[18].mxu0  ;;  %v1101_v42 = vpop.f32.mrb[18].mxu1 }
 0x192   : > { %vm1467_vm0 = vcmp.ge.f32.partialorder %v1403_v37, 0.0  ;;  %v1531_v43 = vmul.f32 0.2, %v1403_v37  ;;  %vm1499_vm1 = vcmp.ge.f32.partialorder %v1435_v38, 0.0  ;;  %v1563_v44 = vmul.f32 0.2, %v1435_v38 }
 0x193   : > { %v1404_v45 = vadd.f32 %v2615_v17, %v973_v41  ;;  %v1436_v46 = vadd.f32 %v2615_v17, %v1101_v42  ;;  %v975_v47 = vpop.f32.mrb[19].mxu0  ;;  %v1103_v48 = vpop.f32.mrb[19].mxu1 }
 0x194   : > { %v1595_v49 = vsel %vm1467_vm0, %v1403_v37, %v1531_v43  ;;  %v1627_v50 = vsel %vm1499_vm1, %v1435_v38, %v1563_v44 }
 0x195   : > { %1659 = vst [vmem:[%s2623_s24 + $0x40] sm:$0xff] %v1595_v49  ;;  %1691 = vst [vmem:[%s2623_s24 + $0x140] sm:$0xff] %v1627_v50  ;;  %vm1468_vm2 = vcmp.ge.f32.partialorder %v1404_v45, 0.0  ;;  %v1532_v51 = vmul.f32 0.2, %v1404_v45  ;;  %vm1500_vm3 = vcmp.ge.f32.partialorder %v1436_v46, 0.0 }
 0x196   : > { %v1564_v52 = vmul.f32 0.2, %v1436_v46 }
 0x197   : > { %v1596_v53 = vsel %vm1468_vm2, %v1404_v45, %v1532_v51  ;;  %v978_v55 = vpop.f32.mrb[20].mxu0  ;;  %v1106_v56 = vpop.f32.mrb[20].mxu1 }
 0x198   : > { %v1628_v54 = vsel %vm1500_vm3, %v1436_v46, %v1564_v52  ;;  %1660 = vst [vmem:[%s2623_s24 + $0x48] sm:$0xff] %v1596_v53  ;;  %v1405_v57 = vadd.f32 %v2615_v17, %v978_v55  ;;  %v1437_v58 = vadd.f32 %v2615_v17, %v1106_v56  ;;  %v980_v59 = vpop.f32.mrb[21].mxu0  ;;  %v1108_v60 = vpop.f32.mrb[21].mxu1 }
 0x199   : > { %1692 = vst [vmem:[%s2623_s24 + $0x148] sm:$0xff] %v1628_v54  ;;  %v981_v61 = vpop.f32.mrb[22].mxu0  ;;  %v1109_v62 = vpop.f32.mrb[22].mxu1 }
 0x19a   : > { %vm1469_vm4 = vcmp.ge.f32.partialorder %v1405_v57, 0.0  ;;  %v1533_v63 = vmul.f32 0.2, %v1405_v57  ;;  %vm1501_vm5 = vcmp.ge.f32.partialorder %v1437_v58, 0.0  ;;  %v1565_v0 = vmul.f32 0.2, %v1437_v58 }
 0x19b   : > { %v1406_v1 = vadd.f32 %v2615_v17, %v981_v61  ;;  %v1438_v2 = vadd.f32 %v2615_v17, %v1109_v62  ;;  %v983_v3 = vpop.f32.mrb[23].mxu0  ;;  %v1111_v4 = vpop.f32.mrb[23].mxu1 }
 0x19c   : > { %v1597_v5 = vsel %vm1469_vm4, %v1405_v57, %v1533_v63  ;;  %v1629_v6 = vsel %vm1501_vm5, %v1437_v58, %v1565_v0 }
 0x19d   : > { %1661 = vst [vmem:[%s2623_s24 + $0x50] sm:$0xff] %v1597_v5  ;;  %1693 = vst [vmem:[%s2623_s24 + $0x150] sm:$0xff] %v1629_v6  ;;  %vm1470_vm6 = vcmp.ge.f32.partialorder %v1406_v1, 0.0  ;;  %v1534_v7 = vmul.f32 0.2, %v1406_v1  ;;  %vm1502_vm7 = vcmp.ge.f32.partialorder %v1438_v2, 0.0 }
 0x19e   : > { %v1566_v8 = vmul.f32 0.2, %v1438_v2 }
 0x19f   : > { %v1598_v9 = vsel %vm1470_vm6, %v1406_v1, %v1534_v7  ;;  %v986_v11 = vpop.f32.mrb[24].mxu0  ;;  %v1114_v12 = vpop.f32.mrb[24].mxu1 }
 0x1a0   : > { %v1630_v10 = vsel %vm1502_vm7, %v1438_v2, %v1566_v8  ;;  %1662 = vst [vmem:[%s2623_s24 + $0x58] sm:$0xff] %v1598_v9  ;;  %v1407_v13 = vadd.f32 %v2615_v17, %v986_v11  ;;  %v1439_v14 = vadd.f32 %v2615_v17, %v1114_v12  ;;  %v988_v15 = vpop.f32.mrb[25].mxu0  ;;  %v1116_v16 = vpop.f32.mrb[25].mxu1 }
 0x1a1   : > { %1694 = vst [vmem:[%s2623_s24 + $0x158] sm:$0xff] %v1630_v10  ;;  %v989_v18 = vpop.f32.mrb[26].mxu0  ;;  %v1117_v19 = vpop.f32.mrb[26].mxu1 }
 0x1a2   : > { %vm1471_vm8 = vcmp.ge.f32.partialorder %v1407_v13, 0.0  ;;  %v1535_v20 = vmul.f32 0.2, %v1407_v13  ;;  %vm1503_vm9 = vcmp.ge.f32.partialorder %v1439_v14, 0.0  ;;  %v1567_v21 = vmul.f32 0.2, %v1439_v14 }
 0x1a3   : > { %v1408_v22 = vadd.f32 %v2615_v17, %v989_v18  ;;  %v1440_v23 = vadd.f32 %v2615_v17, %v1117_v19  ;;  %v991_v24 = vpop.f32.mrb[27].mxu0  ;;  %v1119_v25 = vpop.f32.mrb[27].mxu1 }
 0x1a4   : > { %v1599_v26 = vsel %vm1471_vm8, %v1407_v13, %v1535_v20  ;;  %v1631_v27 = vsel %vm1503_vm9, %v1439_v14, %v1567_v21 }
 0x1a5   : > { %1663 = vst [vmem:[%s2623_s24 + $0x60] sm:$0xff] %v1599_v26  ;;  %1695 = vst [vmem:[%s2623_s24 + $0x160] sm:$0xff] %v1631_v27  ;;  %vm1472_vm10 = vcmp.ge.f32.partialorder %v1408_v22, 0.0  ;;  %v1536_v28 = vmul.f32 0.2, %v1408_v22  ;;  %vm1504_vm11 = vcmp.ge.f32.partialorder %v1440_v23, 0.0 }
 0x1a6   : > { %v1568_v29 = vmul.f32 0.2, %v1440_v23 }
 0x1a7   : > { %v1600_v30 = vsel %vm1472_vm10, %v1408_v22, %v1536_v28  ;;  %v994_v32 = vpop.f32.mrb[28].mxu0  ;;  %v1122_v33 = vpop.f32.mrb[28].mxu1 }
 0x1a8   : > { %v1632_v31 = vsel %vm1504_vm11, %v1440_v23, %v1568_v29  ;;  %1664 = vst [vmem:[%s2623_s24 + $0x68] sm:$0xff] %v1600_v30  ;;  %v1409_v34 = vadd.f32 %v2615_v17, %v994_v32  ;;  %v1441_v35 = vadd.f32 %v2615_v17, %v1122_v33  ;;  %v996_v36 = vpop.f32.mrb[29].mxu0  ;;  %v1124_v37 = vpop.f32.mrb[29].mxu1 }
 0x1a9   : > { %1696 = vst [vmem:[%s2623_s24 + $0x168] sm:$0xff] %v1632_v31  ;;  %v997_v38 = vpop.f32.mrb[30].mxu0  ;;  %v1125_v39 = vpop.f32.mrb[30].mxu1 }
 0x1aa   : > { %vm1473_vm12 = vcmp.ge.f32.partialorder %v1409_v34, 0.0  ;;  %v1537_v40 = vmul.f32 0.2, %v1409_v34  ;;  %vm1505_vm13 = vcmp.ge.f32.partialorder %v1441_v35, 0.0  ;;  %v1569_v41 = vmul.f32 0.2, %v1441_v35 }
 0x1ab   : > { %v1410_v42 = vadd.f32 %v2615_v17, %v997_v38  ;;  %v1442_v43 = vadd.f32 %v2615_v17, %v1125_v39  ;;  %v999_v44 = vpop.f32.mrb[31].mxu0  ;;  %v1127_v45 = vpop.f32.mrb[31].mxu1 }
 0x1ac   : > { %v1601_v46 = vsel %vm1473_vm12, %v1409_v34, %v1537_v40  ;;  %v1633_v47 = vsel %vm1505_vm13, %v1441_v35, %v1569_v41 }
 0x1ad   : > { %1665 = vst [vmem:[%s2623_s24 + $0x70] sm:$0xff] %v1601_v46  ;;  %1697 = vst [vmem:[%s2623_s24 + $0x170] sm:$0xff] %v1633_v47  ;;  %vm1474_vm14 = vcmp.ge.f32.partialorder %v1410_v42, 0.0  ;;  %v1538_v48 = vmul.f32 0.2, %v1410_v42  ;;  %vm1506_vm15 = vcmp.ge.f32.partialorder %v1442_v43, 0.0 }
 0x1ae   : > { %v1570_v49 = vmul.f32 0.2, %v1442_v43 }
 0x1af   : > { %v1602_v50 = vsel %vm1474_vm14, %v1410_v42, %v1538_v48  ;;  %v1002_v52 = vpop.f32.mrb[32].mxu0  ;;  %v1130_v53 = vpop.f32.mrb[32].mxu1 }
 0x1b0   : > { %v1634_v51 = vsel %vm1506_vm15, %v1442_v43, %v1570_v49  ;;  %1666 = vst [vmem:[%s2623_s24 + $0x78] sm:$0xff] %v1602_v50  ;;  %v1411_v54 = vadd.f32 %v2615_v17, %v1002_v52  ;;  %v1443_v55 = vadd.f32 %v2615_v17, %v1130_v53  ;;  %v1004_v56 = vpop.f32.mrb[33].mxu0  ;;  %v1132_v57 = vpop.f32.mrb[33].mxu1 }
 0x1b1   : > { %1698 = vst [vmem:[%s2623_s24 + $0x178] sm:$0xff] %v1634_v51  ;;  %v1005_v58 = vpop.f32.mrb[34].mxu0  ;;  %v1133_v59 = vpop.f32.mrb[34].mxu1 }
 0x1b2   : > { %vm1475_vm0 = vcmp.ge.f32.partialorder %v1411_v54, 0.0  ;;  %v1539_v60 = vmul.f32 0.2, %v1411_v54  ;;  %vm1507_vm1 = vcmp.ge.f32.partialorder %v1443_v55, 0.0  ;;  %v1571_v61 = vmul.f32 0.2, %v1443_v55 }
 0x1b3   : > { %v1412_v62 = vadd.f32 %v2615_v17, %v1005_v58  ;;  %v1444_v63 = vadd.f32 %v2615_v17, %v1133_v59  ;;  %v1007_v0 = vpop.f32.mrb[35].mxu0  ;;  %v1135_v1 = vpop.f32.mrb[35].mxu1 }
 0x1b4   : > { %v1603_v2 = vsel %vm1475_vm0, %v1411_v54, %v1539_v60  ;;  %v1635_v3 = vsel %vm1507_vm1, %v1443_v55, %v1571_v61 }
 0x1b5   : > { %1667 = vst [vmem:[%s2623_s24 + $0x80] sm:$0xff] %v1603_v2  ;;  %1699 = vst [vmem:[%s2623_s24 + $0x180] sm:$0xff] %v1635_v3  ;;  %vm1476_vm2 = vcmp.ge.f32.partialorder %v1412_v62, 0.0  ;;  %v1540_v4 = vmul.f32 0.2, %v1412_v62  ;;  %vm1508_vm3 = vcmp.ge.f32.partialorder %v1444_v63, 0.0 }
 0x1b6   : > { %v1572_v5 = vmul.f32 0.2, %v1444_v63 }
 0x1b7   : > { %v1604_v6 = vsel %vm1476_vm2, %v1412_v62, %v1540_v4  ;;  %v1010_v8 = vpop.f32.mrb[36].mxu0  ;;  %v1138_v9 = vpop.f32.mrb[36].mxu1 }
 0x1b8   : > { %v1636_v7 = vsel %vm1508_vm3, %v1444_v63, %v1572_v5  ;;  %1668 = vst [vmem:[%s2623_s24 + $0x88] sm:$0xff] %v1604_v6  ;;  %v1413_v10 = vadd.f32 %v2615_v17, %v1010_v8  ;;  %v1445_v11 = vadd.f32 %v2615_v17, %v1138_v9  ;;  %v1012_v12 = vpop.f32.mrb[37].mxu0  ;;  %v1140_v13 = vpop.f32.mrb[37].mxu1 }
 0x1b9   : > { %1700 = vst [vmem:[%s2623_s24 + $0x188] sm:$0xff] %v1636_v7  ;;  %v1013_v14 = vpop.f32.mrb[38].mxu0  ;;  %v1141_v15 = vpop.f32.mrb[38].mxu1 }
 0x1ba   : > { %vm1477_vm4 = vcmp.ge.f32.partialorder %v1413_v10, 0.0  ;;  %v1541_v16 = vmul.f32 0.2, %v1413_v10  ;;  %vm1509_vm5 = vcmp.ge.f32.partialorder %v1445_v11, 0.0  ;;  %v1573_v18 = vmul.f32 0.2, %v1445_v11 }
 0x1bb   : > { %v1414_v19 = vadd.f32 %v2615_v17, %v1013_v14  ;;  %v1446_v20 = vadd.f32 %v2615_v17, %v1141_v15  ;;  %v1015_v21 = vpop.f32.mrb[39].mxu0  ;;  %v1143_v22 = vpop.f32.mrb[39].mxu1 }
 0x1bc   : > { %v1605_v23 = vsel %vm1477_vm4, %v1413_v10, %v1541_v16  ;;  %v1637_v24 = vsel %vm1509_vm5, %v1445_v11, %v1573_v18 }
 0x1bd   : > { %1669 = vst [vmem:[%s2623_s24 + $0x90] sm:$0xff] %v1605_v23  ;;  %1701 = vst [vmem:[%s2623_s24 + $0x190] sm:$0xff] %v1637_v24  ;;  %vm1478_vm6 = vcmp.ge.f32.partialorder %v1414_v19, 0.0  ;;  %v1542_v25 = vmul.f32 0.2, %v1414_v19  ;;  %vm1510_vm7 = vcmp.ge.f32.partialorder %v1446_v20, 0.0 }
 0x1be   : > { %v1574_v26 = vmul.f32 0.2, %v1446_v20 }
 0x1bf   : > { %v1606_v27 = vsel %vm1478_vm6, %v1414_v19, %v1542_v25  ;;  %v1018_v29 = vpop.f32.mrb[40].mxu0  ;;  %v1146_v30 = vpop.f32.mrb[40].mxu1 }
 0x1c0   : > { %v1638_v28 = vsel %vm1510_vm7, %v1446_v20, %v1574_v26  ;;  %1670 = vst [vmem:[%s2623_s24 + $0x98] sm:$0xff] %v1606_v27  ;;  %v1415_v31 = vadd.f32 %v2615_v17, %v1018_v29  ;;  %v1447_v32 = vadd.f32 %v2615_v17, %v1146_v30  ;;  %v1020_v33 = vpop.f32.mrb[41].mxu0  ;;  %v1148_v34 = vpop.f32.mrb[41].mxu1 }
 0x1c1   : > { %1702 = vst [vmem:[%s2623_s24 + $0x198] sm:$0xff] %v1638_v28  ;;  %v1021_v35 = vpop.f32.mrb[42].mxu0  ;;  %v1149_v36 = vpop.f32.mrb[42].mxu1 }
 0x1c2   : > { %vm1479_vm8 = vcmp.ge.f32.partialorder %v1415_v31, 0.0  ;;  %v1543_v37 = vmul.f32 0.2, %v1415_v31  ;;  %vm1511_vm9 = vcmp.ge.f32.partialorder %v1447_v32, 0.0  ;;  %v1575_v38 = vmul.f32 0.2, %v1447_v32 }
 0x1c3   : > { %v1416_v39 = vadd.f32 %v2615_v17, %v1021_v35  ;;  %v1448_v40 = vadd.f32 %v2615_v17, %v1149_v36  ;;  %v1023_v41 = vpop.f32.mrb[43].mxu0  ;;  %v1151_v42 = vpop.f32.mrb[43].mxu1 }
 0x1c4   : > { %v1607_v43 = vsel %vm1479_vm8, %v1415_v31, %v1543_v37  ;;  %v1639_v44 = vsel %vm1511_vm9, %v1447_v32, %v1575_v38 }
 0x1c5   : > { %1671 = vst [vmem:[%s2623_s24 + $0xa0] sm:$0xff] %v1607_v43  ;;  %1703 = vst [vmem:[%s2623_s24 + $0x1a0] sm:$0xff] %v1639_v44  ;;  %vm1480_vm10 = vcmp.ge.f32.partialorder %v1416_v39, 0.0  ;;  %v1544_v45 = vmul.f32 0.2, %v1416_v39  ;;  %vm1512_vm11 = vcmp.ge.f32.partialorder %v1448_v40, 0.0 }
 0x1c6   : > { %v1576_v46 = vmul.f32 0.2, %v1448_v40 }
 0x1c7   : > { %v1608_v47 = vsel %vm1480_vm10, %v1416_v39, %v1544_v45  ;;  %v1026_v49 = vpop.f32.mrb[44].mxu0  ;;  %v1154_v50 = vpop.f32.mrb[44].mxu1 }
 0x1c8   : > { %v1640_v48 = vsel %vm1512_vm11, %v1448_v40, %v1576_v46  ;;  %1672 = vst [vmem:[%s2623_s24 + $0xa8] sm:$0xff] %v1608_v47  ;;  %v1417_v51 = vadd.f32 %v2615_v17, %v1026_v49  ;;  %v1449_v52 = vadd.f32 %v2615_v17, %v1154_v50  ;;  %v1028_v53 = vpop.f32.mrb[45].mxu0  ;;  %v1156_v54 = vpop.f32.mrb[45].mxu1 }
 0x1c9   : > { %1704 = vst [vmem:[%s2623_s24 + $0x1a8] sm:$0xff] %v1640_v48  ;;  %v1029_v55 = vpop.f32.mrb[46].mxu0  ;;  %v1157_v56 = vpop.f32.mrb[46].mxu1 }
 0x1ca   : > { %vm1481_vm12 = vcmp.ge.f32.partialorder %v1417_v51, 0.0  ;;  %v1545_v57 = vmul.f32 0.2, %v1417_v51  ;;  %vm1513_vm13 = vcmp.ge.f32.partialorder %v1449_v52, 0.0  ;;  %v1577_v58 = vmul.f32 0.2, %v1449_v52 }
 0x1cb   : > { %v1418_v59 = vadd.f32 %v2615_v17, %v1029_v55  ;;  %v1450_v60 = vadd.f32 %v2615_v17, %v1157_v56  ;;  %v1031_v61 = vpop.f32.mrb[47].mxu0  ;;  %v1159_v62 = vpop.f32.mrb[47].mxu1 }
 0x1cc   : > { %v1609_v63 = vsel %vm1481_vm12, %v1417_v51, %v1545_v57  ;;  %v1641_v0 = vsel %vm1513_vm13, %v1449_v52, %v1577_v58 }
 0x1cd   : > { %1673 = vst [vmem:[%s2623_s24 + $0xb0] sm:$0xff] %v1609_v63  ;;  %1705 = vst [vmem:[%s2623_s24 + $0x1b0] sm:$0xff] %v1641_v0  ;;  %vm1482_vm14 = vcmp.ge.f32.partialorder %v1418_v59, 0.0  ;;  %v1546_v1 = vmul.f32 0.2, %v1418_v59  ;;  %vm1514_vm15 = vcmp.ge.f32.partialorder %v1450_v60, 0.0 }
 0x1ce   : > { %v1578_v2 = vmul.f32 0.2, %v1450_v60 }
 0x1cf   : > { %v1610_v3 = vsel %vm1482_vm14, %v1418_v59, %v1546_v1  ;;  %v1034_v5 = vpop.f32.mrb[48].mxu0  ;;  %v1162_v6 = vpop.f32.mrb[48].mxu1 }
 0x1d0   : > { %v1642_v4 = vsel %vm1514_vm15, %v1450_v60, %v1578_v2  ;;  %1674 = vst [vmem:[%s2623_s24 + $0xb8] sm:$0xff] %v1610_v3  ;;  %v1419_v7 = vadd.f32 %v2615_v17, %v1034_v5  ;;  %v1451_v8 = vadd.f32 %v2615_v17, %v1162_v6  ;;  %v1036_v9 = vpop.f32.mrb[49].mxu0  ;;  %v1164_v10 = vpop.f32.mrb[49].mxu1 }
 0x1d1   : > { %1706 = vst [vmem:[%s2623_s24 + $0x1b8] sm:$0xff] %v1642_v4  ;;  %v1037_v11 = vpop.f32.mrb[50].mxu0  ;;  %v1165_v12 = vpop.f32.mrb[50].mxu1 }
 0x1d2   : > { %vm1483_vm0 = vcmp.ge.f32.partialorder %v1419_v7, 0.0  ;;  %v1547_v13 = vmul.f32 0.2, %v1419_v7  ;;  %vm1515_vm1 = vcmp.ge.f32.partialorder %v1451_v8, 0.0  ;;  %v1579_v14 = vmul.f32 0.2, %v1451_v8 }
 0x1d3   : > { %v1420_v15 = vadd.f32 %v2615_v17, %v1037_v11  ;;  %v1452_v16 = vadd.f32 %v2615_v17, %v1165_v12  ;;  %v1039_v18 = vpop.f32.mrb[51].mxu0  ;;  %v1167_v19 = vpop.f32.mrb[51].mxu1 }
 0x1d4   : > { %v1611_v20 = vsel %vm1483_vm0, %v1419_v7, %v1547_v13  ;;  %v1643_v21 = vsel %vm1515_vm1, %v1451_v8, %v1579_v14 }
 0x1d5   : > { %1675 = vst [vmem:[%s2623_s24 + $0xc0] sm:$0xff] %v1611_v20  ;;  %1707 = vst [vmem:[%s2623_s24 + $0x1c0] sm:$0xff] %v1643_v21  ;;  %vm1484_vm2 = vcmp.ge.f32.partialorder %v1420_v15, 0.0  ;;  %v1548_v22 = vmul.f32 0.2, %v1420_v15  ;;  %vm1516_vm3 = vcmp.ge.f32.partialorder %v1452_v16, 0.0 }
 0x1d6   : > { %v1580_v23 = vmul.f32 0.2, %v1452_v16 }
 0x1d7   : > { %v1612_v24 = vsel %vm1484_vm2, %v1420_v15, %v1548_v22  ;;  %v1042_v26 = vpop.f32.mrb[52].mxu0  ;;  %v1170_v27 = vpop.f32.mrb[52].mxu1 }
 0x1d8   : > { %v1644_v25 = vsel %vm1516_vm3, %v1452_v16, %v1580_v23  ;;  %1676 = vst [vmem:[%s2623_s24 + $0xc8] sm:$0xff] %v1612_v24  ;;  %v1421_v28 = vadd.f32 %v2615_v17, %v1042_v26  ;;  %v1453_v29 = vadd.f32 %v2615_v17, %v1170_v27  ;;  %v1044_v30 = vpop.f32.mrb[53].mxu0  ;;  %v1172_v31 = vpop.f32.mrb[53].mxu1 }
 0x1d9   : > { %1708 = vst [vmem:[%s2623_s24 + $0x1c8] sm:$0xff] %v1644_v25  ;;  %v1045_v32 = vpop.f32.mrb[54].mxu0  ;;  %v1173_v33 = vpop.f32.mrb[54].mxu1 }
 0x1da   : > { %vm1485_vm4 = vcmp.ge.f32.partialorder %v1421_v28, 0.0  ;;  %v1549_v34 = vmul.f32 0.2, %v1421_v28  ;;  %vm1517_vm5 = vcmp.ge.f32.partialorder %v1453_v29, 0.0  ;;  %v1581_v35 = vmul.f32 0.2, %v1453_v29 }
 0x1db   : > { %v1422_v36 = vadd.f32 %v2615_v17, %v1045_v32  ;;  %v1454_v37 = vadd.f32 %v2615_v17, %v1173_v33  ;;  %v1047_v38 = vpop.f32.mrb[55].mxu0  ;;  %v1175_v39 = vpop.f32.mrb[55].mxu1 }
 0x1dc   : > { %v1613_v40 = vsel %vm1485_vm4, %v1421_v28, %v1549_v34  ;;  %v1645_v41 = vsel %vm1517_vm5, %v1453_v29, %v1581_v35 }
 0x1dd   : > { %1677 = vst [vmem:[%s2623_s24 + $0xd0] sm:$0xff] %v1613_v40  ;;  %1709 = vst [vmem:[%s2623_s24 + $0x1d0] sm:$0xff] %v1645_v41  ;;  %vm1486_vm6 = vcmp.ge.f32.partialorder %v1422_v36, 0.0  ;;  %v1550_v42 = vmul.f32 0.2, %v1422_v36  ;;  %vm1518_vm7 = vcmp.ge.f32.partialorder %v1454_v37, 0.0 }
 0x1de   : > { %v1582_v43 = vmul.f32 0.2, %v1454_v37 }
 0x1df   : > { %v1614_v44 = vsel %vm1486_vm6, %v1422_v36, %v1550_v42  ;;  %v1050_v46 = vpop.f32.mrb[56].mxu0  ;;  %v1178_v47 = vpop.f32.mrb[56].mxu1 }
 0x1e0   : > { %v1646_v45 = vsel %vm1518_vm7, %v1454_v37, %v1582_v43  ;;  %1678 = vst [vmem:[%s2623_s24 + $0xd8] sm:$0xff] %v1614_v44  ;;  %v1423_v48 = vadd.f32 %v2615_v17, %v1050_v46  ;;  %v1455_v49 = vadd.f32 %v2615_v17, %v1178_v47  ;;  %v1052_v50 = vpop.f32.mrb[57].mxu0  ;;  %v1180_v51 = vpop.f32.mrb[57].mxu1 }
 0x1e1   : > { %1710 = vst [vmem:[%s2623_s24 + $0x1d8] sm:$0xff] %v1646_v45  ;;  %v1053_v52 = vpop.f32.mrb[58].mxu0  ;;  %v1181_v53 = vpop.f32.mrb[58].mxu1 }
 0x1e2   : > { %vm1487_vm8 = vcmp.ge.f32.partialorder %v1423_v48, 0.0  ;;  %v1551_v54 = vmul.f32 0.2, %v1423_v48  ;;  %vm1519_vm9 = vcmp.ge.f32.partialorder %v1455_v49, 0.0  ;;  %v1583_v55 = vmul.f32 0.2, %v1455_v49 }
 0x1e3   : > { %v1424_v56 = vadd.f32 %v2615_v17, %v1053_v52  ;;  %v1456_v57 = vadd.f32 %v2615_v17, %v1181_v53  ;;  %v1055_v58 = vpop.f32.mrb[59].mxu0  ;;  %v1183_v59 = vpop.f32.mrb[59].mxu1 }
 0x1e4   : > { %v1615_v60 = vsel %vm1487_vm8, %v1423_v48, %v1551_v54  ;;  %v1647_v61 = vsel %vm1519_vm9, %v1455_v49, %v1583_v55 }
 0x1e5   : > { %1679 = vst [vmem:[%s2623_s24 + $0xe0] sm:$0xff] %v1615_v60  ;;  %1711 = vst [vmem:[%s2623_s24 + $0x1e0] sm:$0xff] %v1647_v61  ;;  %vm1488_vm10 = vcmp.ge.f32.partialorder %v1424_v56, 0.0  ;;  %v1552_v62 = vmul.f32 0.2, %v1424_v56  ;;  %vm1520_vm11 = vcmp.ge.f32.partialorder %v1456_v57, 0.0 }
 0x1e6   : > { %v1584_v63 = vmul.f32 0.2, %v1456_v57 }
 0x1e7   : > { %v1616_v0 = vsel %vm1488_vm10, %v1424_v56, %v1552_v62  ;;  %v1058_v2 = vpop.f32.mrb[60].mxu0  ;;  %v1186_v3 = vpop.f32.mrb[60].mxu1 }
 0x1e8   : > { %v1648_v1 = vsel %vm1520_vm11, %v1456_v57, %v1584_v63  ;;  %1680 = vst [vmem:[%s2623_s24 + $0xe8] sm:$0xff] %v1616_v0  ;;  %v1425_v4 = vadd.f32 %v2615_v17, %v1058_v2  ;;  %v1457_v5 = vadd.f32 %v2615_v17, %v1186_v3  ;;  %v1060_v6 = vpop.f32.mrb[61].mxu0  ;;  %v1188_v7 = vpop.f32.mrb[61].mxu1 }
 0x1e9   : > { %1712 = vst [vmem:[%s2623_s24 + $0x1e8] sm:$0xff] %v1648_v1  ;;  %v1061_v8 = vpop.f32.mrb[62].mxu0  ;;  %v1189_v9 = vpop.f32.mrb[62].mxu1 }
 0x1ea   : > { %vm1489_vm12 = vcmp.ge.f32.partialorder %v1425_v4, 0.0  ;;  %v1553_v10 = vmul.f32 0.2, %v1425_v4  ;;  %vm1521_vm13 = vcmp.ge.f32.partialorder %v1457_v5, 0.0  ;;  %v1585_v11 = vmul.f32 0.2, %v1457_v5 }
 0x1eb   : > { %v1426_v12 = vadd.f32 %v2615_v17, %v1061_v8  ;;  %v1458_v13 = vadd.f32 %v2615_v17, %v1189_v9  ;;  %v1063_v14 = vpop.f32.mrb[63].mxu0  ;;  %v1191_v15 = vpop.f32.mrb[63].mxu1 }
 0x1ec   : > { %v1617_v16 = vsel %vm1489_vm12, %v1425_v4, %v1553_v10  ;;  %v1649_v18 = vsel %vm1521_vm13, %v1457_v5, %v1585_v11 }
 0x1ed   : > { %1681 = vst [vmem:[%s2623_s24 + $0xf0] sm:$0xff] %v1617_v16  ;;  %1713 = vst [vmem:[%s2623_s24 + $0x1f0] sm:$0xff] %v1649_v18  ;;  %vm1490_vm14 = vcmp.ge.f32.partialorder %v1426_v12, 0.0  ;;  %v1554_v19 = vmul.f32 0.2, %v1426_v12  ;;  %vm1522_vm15 = vcmp.ge.f32.partialorder %v1458_v13, 0.0 }
 0x1ee   : > { %v1586_v20 = vmul.f32 0.2, %v1458_v13 }
 0x1ef   : > { %v1618_v17 = vsel %vm1490_vm14, %v1426_v12, %v1554_v19 }
 0x1f0   : > { %v1650_v21 = vsel %vm1522_vm15, %v1458_v13, %v1586_v20  ;;  %1682 = vst [vmem:[%s2623_s24 + $0xf8] sm:$0xff] %v1618_v17 }
 0x1f1   : > { %1714 = vst [vmem:[%s2623_s24 + $0x1f8] sm:$0xff] %v1650_v21 }
 0x1f2   : > { %2243 = shalt.err (!%p2240_p5)
}
 0x1f3   : > { %s2244_s25 = scalar_lea.hbm %s2752_s18, 8192  ;;  %s2248_s6 = scalar_lea.hbm %s2808_s3, 16384 }
 0x1f4   : > { %p2245_p9 = scmp.ne.s32.totalorder %s2752_s18, %s2244_s25  ;;  %p2249_p3 = scmp.lt.u32.totalorder %s2752_s18, %s2808_s3 }
 0x1f5   : > { %p2250_p7 = scmp.lt.u32.totalorder %s2248_s6, %s2244_s25  ;;  %p2252_p4 = scmp.lt.u32.totalorder %s2244_s25, %s2752_s18 }
 0x1f6   : > { %p2246_p1 = pnand %p2245_p9, %p2444_p10 }
 0x1f7   : > { %p2251_p13 = por %p2250_p7, %p2249_p3 }
 0x1f8   : > { %p2247_p2 = pneg %p2246_p1 }
 0x1f9   : > { %p2253_p6 = por %p2252_p4, %p2251_p13 }
 0x1fb   : > { %p2254_p8 = pnand %p2253_p6, %p2247_p2 }
 0x1fd   : > { %2257 = shalt.err (!%p2254_p8)
}
 0x1fe   : > { %s2326_s24 = smov 128   ;;  %s2327_s9 = smov 8  }
 0x1ff   : > { %1986 = dma.vmem_to_hbm [thread:$0]  (%p2444_p10), %s2754_s10, 8192, %s2752_s18, %s1716_s26, %s2326_s24, %s2326_s24, %s2327_s9  }
 0x200 PF: > { %s1745_s15 = sand.u32 1, %s2296_s12   ;;  %p2826_p12 = scmp.ne.s32.totalorder %s2816_s23, 0 }
 0x201   : > { %p2827_p11 = scmp.ge.s32.totalorder %s2316_s17, 2  ;;  %s1746_s11 = scalar_lea.sflag [#allocation5], %s1745_s15 }
 0x203   : > { %p1997_p0 = pnand %p2827_p11, %p2826_p12 }
 0x205   : > { %2291 = dma.done.wait (!%p1997_p0), %s1746_s11, 8192  }
 0x206   : > { %2293 = vsyncadd (!%p1997_p0), %s1746_s11, 4294959104  ;;  %s20_s17 = sadd.s32 1, %s2316_s17   ;;  %s2828_s12 = smov %s2300_s13 }
 0x207   : > { %p17_p5 = scmp.ge.s32.totalorder %s20_s17, 4   ;;  %s2829_s13 = smov %s2304_s14 }
 0x208   : > { %s2830_s14 = smov %s2453_s5  ;;  %s2831_s15 = smov %s2312_s16 }
 0x209   : > { %s2832_s16 = smov %s2834_s28  ;;  %19 = sbr.rel (!%p17_p5) target bundleno = 7 (0x7), region = 93 }
 0x210   :  { %1751 = vsyncpa [#allocation4], 1 }
 0x211   :  { %1753 = vsyncpa [#allocation4 + $0x1], 1 }
 0x212   :  { %1754 = vsyncpa [#allocation7], 1 }
 0x213   :  { %1755 = vsyncpa [#allocation5], 1 }
 0x214   :  { %1757 = vsyncpa [#allocation5 + $0x1], 1 }

</bundles_post_ra>
